<compile_context>
chip_gen: v6e
topology: v6e:2x2x1
jax: 0.10.0
libtpu: 0.0.40
codegen_flags: <defaults>
</compile_context>

<pallas_src>
import jax
import jax.numpy as jnp
from jax.experimental import pallas as pl
from jax.experimental.pallas import tpu as pltpu


def _h_sigmoid(x):
    # relu6(x + 3) * (1/6)
    return jnp.clip(x + 3.0, 0.0, 6.0) * (1.0 / 6.0)


def _h_swish(x):
    return x * _h_sigmoid(x)


def inverted_residual(x_nchw, params, *, kernel_size, stride, use_se, use_hs,
                      block_batch=2, mxu_dtype=jnp.bfloat16):
    """Pallas forward.  x_nchw: (B, Cin, H, W) f32 -> (B, oup, Ho, Wo) f32."""
    B, Cin, H, W = x_nchw.shape
    hid = params["w1"].shape[1]
    oup = params["w3"].shape[1]
    k = kernel_size
    p = (k - 1) // 2
    HW = H * W
    Ho = (H + 2 * p - k) // stride + 1
    Wo = (W + 2 * p - k) // stride + 1
    HWo = Ho * Wo
    identity = (stride == 1) and (Cin == oup)

    # ---- batch blocking: Bblk images per grid step (lane axis = Bblk*HW) ----
    Bblk = max(1, min(block_batch, B))
    while B % Bblk:
        Bblk -= 1
    L = Bblk * HW      # lane width of the activation tiles
    Lo = Bblk * HWo    # lane width after the (optional) strided subsample
    steps = B // Bblk

    f32 = jnp.float32

    # ---- one-off host-side parameter re-layout + BN-scale folding -----------
    bn1s = params["bn1_s"].reshape(-1).astype(f32)
    bn2s = params["bn2_s"].reshape(-1).astype(f32)
    bn3s = params["bn3_s"].reshape(-1).astype(f32)
    w1_t = (jnp.transpose(params["w1"]).astype(f32) * bn1s[:, None]).astype(mxu_dtype)   # (hid, Cin)
    w3_t = (jnp.transpose(params["w3"]).astype(f32) * bn3s[:, None]).astype(mxu_dtype)   # (oup, hid)
    wse1 = jnp.transpose(params["w_se1"]).astype(f32)     # (hid//4, hid)
    wse2 = jnp.transpose(params["w_se2"]).astype(f32)     # (hid, hid//4)
    bn1b = params["bn1_b"].reshape(hid, 1).astype(f32)
    bn2b = params["bn2_b"].reshape(hid, 1).astype(f32)
    bn3b = params["bn3_b"].reshape(oup, 1).astype(f32)

    # fused per-tap table: zero-pad boundary mask * tap weight * bn2 scale
    dwv = params["w_dw"].reshape(k * k, hid).astype(f32) * bn2s[None, :]       # (k*k, hid)
    idx = jnp.arange(HW, dtype=jnp.int32)
    yi, xi = idx // W, idx % W
    masks, shift_amts = [], []
    for kh in range(k):
        for kw in range(k):
            dy, dx = kh - p, kw - p
            valid = ((yi + dy >= 0) & (yi + dy < H) &
                     (xi + dx >= 0) & (xi + dx < W)).astype(f32)
            masks.append(jnp.tile(valid, Bblk))            # (L,)
            shift_amts.append((-(dy * W + dx)) % L)        # static ints
    mask_arr = jnp.stack(masks, axis=0)                    # (k*k, L)
    dw_table = dwv[:, :, None] * mask_arr[:, None, :]      # (k*k, hid, L)

    # channels on sublanes, (batch-block, spatial) flattened on lanes
    x2 = (x_nchw.reshape(B, Cin, HW).transpose(1, 0, 2)
          .reshape(Cin, B * HW).astype(f32))

    def kernel(x_ref, w1_ref, bn1b_ref, dwt_ref, bn2b_ref,
               wse1_ref, wse2_ref, w3_ref, bn3b_ref, *rest):
        if stride != 1:
            colsel_ref, o_ref, dw_scr, sub_scr = rest
        else:
            (o_ref,) = rest

        x = x_ref[...]                                      # (Cin, L) f32

        # --- 1x1 expand conv (bn1 scale pre-folded): MXU, lane-dense N ------
        h = jnp.dot(w1_ref[...], x.astype(mxu_dtype),
                    preferred_element_type=jnp.float32)     # (hid, L)
        h = h + bn1b_ref[...]
        h = _h_swish(h) if use_hs else jnp.maximum(h, 0.0)

        # --- k x k depthwise conv: lane rolls (XLU) + fused tap table -------
        amt0 = shift_amts[0]
        sh = h if amt0 == 0 else pltpu.roll(h, amt0, 1)
        acc = sh * dwt_ref[0]                               # init from tap 0
        for j in range(1, k * k):
            amt = shift_amts[j]
            sh = h if amt == 0 else pltpu.roll(h, amt, 1)
            acc = acc + sh * dwt_ref[j]

        if stride != 1:
            # strided spatial subsample without the dense (HW, HWo) selector:
            # static contiguous row slices + tiny (W, Wo) column-select dot.
            dw_scr[...] = acc
            csel = colsel_ref[...]                          # (W, Wo) one-hot
            for b in range(Bblk):
                for ho in range(Ho):
                    row = dw_scr[:, pl.ds(b * HW + ho * stride * W, W)]
                    sub_scr[:, pl.ds(b * HWo + ho * Wo, Wo)] = jnp.dot(
                        row, csel, preferred_element_type=jnp.float32)
            acc = sub_scr[...]                              # (hid, Lo)

        acc = acc + bn2b_ref[...]

        # --- squeeze & excite: per-image mean + 2 FCs batched over images ----
        if use_se:
            lane = jax.lax.broadcasted_iota(jnp.int32, (Bblk, Lo), 1)
            base = jax.lax.broadcasted_iota(jnp.int32, (Bblk, Lo), 0) * HWo
            mem = ((lane >= base) & (lane < base + HWo)).astype(jnp.float32)
            laneT = jax.lax.broadcasted_iota(jnp.int32, (Lo, Bblk), 0)
            baseT = jax.lax.broadcasted_iota(jnp.int32, (Lo, Bblk), 1) * HWo
            memT = ((laneT >= baseT) & (laneT < baseT + HWo)).astype(jnp.float32)
            y = jnp.dot(acc, memT,
                        preferred_element_type=jnp.float32) * (1.0 / HWo)   # (hid, Bblk)
            z = jnp.maximum(
                jnp.dot(wse1_ref[...], y, preferred_element_type=jnp.float32), 0.0)
            g = _h_sigmoid(
                jnp.dot(wse2_ref[...], z, preferred_element_type=jnp.float32))
            acc = acc * jnp.dot(g, mem, preferred_element_type=jnp.float32)

        acc = _h_swish(acc) if use_hs else jnp.maximum(acc, 0.0)

        # --- 1x1 project conv (bn3 scale pre-folded) + bias + residual ------
        out = jnp.dot(w3_ref[...], acc.astype(mxu_dtype),
                      preferred_element_type=jnp.float32)   # (oup, Lo)
        out = out + bn3b_ref[...]
        if identity:
            out = out + x
        o_ref[...] = out.astype(o_ref.dtype)                # lane-dense store

    in_specs = [
        pl.BlockSpec((Cin, L), lambda g: (0, g)),           # x (Bblk images)
        pl.BlockSpec((hid, Cin), lambda g: (0, 0)),          # w1^T * bn1_s (bf16)
        pl.BlockSpec((hid, 1), lambda g: (0, 0)),             # bn1 bias
        pl.BlockSpec((k * k, hid, L), lambda g: (0, 0, 0)),   # fused dw table
        pl.BlockSpec((hid, 1), lambda g: (0, 0)),             # bn2 bias
        pl.BlockSpec((hid // 4, hid), lambda g: (0, 0)),      # SE fc1 (pre-T)
        pl.BlockSpec((hid, hid // 4), lambda g: (0, 0)),      # SE fc2 (pre-T)
        pl.BlockSpec((oup, hid), lambda g: (0, 0)),           # w3^T * bn3_s (bf16)
        pl.BlockSpec((oup, 1), lambda g: (0, 0)),             # bn3 bias
    ]
    args = [x2, w1_t, bn1b, dw_table, bn2b, wse1, wse2, w3_t, bn3b]
    scratch = []
    if stride != 1:
        colsel = (jnp.arange(W)[:, None] ==
                  (jnp.arange(Wo) * stride)[None, :]).astype(f32)   # (W, Wo)
        in_specs.append(pl.BlockSpec((W, Wo), lambda g: (0, 0)))
        args.append(colsel)
        scratch = [pltpu.VMEM((hid, L), jnp.float32),
                   pltpu.VMEM((hid, Lo), jnp.float32)]

    out2 = pl.pallas_call(
        kernel,
        out_shape=jax.ShapeDtypeStruct((oup, B * HWo), jnp.float32),
        grid_spec=pltpu.PrefetchScalarGridSpec(
            num_scalar_prefetch=0,
            grid=(steps,),
            in_specs=in_specs,
            out_specs=pl.BlockSpec((oup, Lo), lambda g: (0, g)),
            scratch_shapes=scratch),
        compiler_params=pltpu.CompilerParams(
            dimension_semantics=("parallel",),
            vmem_limit_bytes=32 * 1024 * 1024),
    )(*args)

    return out2.reshape(oup, B, Ho, Wo).transpose(1, 0, 2, 3)


def inverted_residual_ref(x_nchw, params, *, kernel_size, stride, use_se, use_hs):
    """Pure-JAX f32 reference for correctness checking (same folded params)."""
    x = jnp.transpose(x_nchw, (0, 2, 3, 1)).astype(jnp.float32)
    B, H, W, Cin = x.shape
    hid = params["w1"].shape[1]
    oup = params["w3"].shape[1]
    k = kernel_size
    p = (k - 1) // 2
    Ho = (H + 2 * p - k) // stride + 1
    Wo = (W + 2 * p - k) // stride + 1

    h = jnp.einsum("bhwc,cd->bhwd", x, params["w1"])
    h = h * params["bn1_s"] + params["bn1_b"]
    h = _h_swish(h) if use_hs else jnp.maximum(h, 0.0)

    hp = jnp.pad(h, ((0, 0), (p, p), (p, p), (0, 0)))
    acc = jnp.zeros((B, Ho, Wo, hid), jnp.float32)
    for kh in range(k):
        for kw in range(k):
            win = hp[:, kh:kh + (Ho - 1) * stride + 1:stride,
                     kw:kw + (Wo - 1) * stride + 1:stride, :]
            acc = acc + win * params["w_dw"][kh, kw]
    acc = acc * params["bn2_s"] + params["bn2_b"]

    if use_se:
        y = jnp.mean(acc, axis=(1, 2))
        y = jnp.maximum(y @ params["w_se1"], 0.0)
        y = _h_sigmoid(y @ params["w_se2"])
        acc = acc * y[:, None, None, :]

    acc = _h_swish(acc) if use_hs else jnp.maximum(acc, 0.0)

    out = jnp.einsum("bhwc,cd->bhwd", acc, params["w3"])
    out = out * params["bn3_s"] + params["bn3_b"]
    if stride == 1 and Cin == oup:
        out = out + x
    return jnp.transpose(out, (0, 3, 1, 2))


if __name__ == "__main__":
    def make_params(key, cin, hid, oup, k):
        keys = jax.random.split(key, 17)

        def bn_fold(kg, kb, km, kv, c):
            gamma = 1.0 + 0.1 * jax.random.normal(kg, (c,), jnp.float32)
            beta = 0.1 * jax.random.normal(kb, (c,), jnp.float32)
            mean = 0.1 * jax.random.normal(km, (c,), jnp.float32)
            var = 1.0 + 0.1 * jax.random.uniform(kv, (c,), jnp.float32)
            s = gamma / jnp.sqrt(var + 1e-5)
            b = beta - mean * s
            return s.reshape(1, c), b.reshape(1, c)

        bn1_s, bn1_b = bn_fold(keys[0], keys[1], keys[2], keys[3], hid)
        bn2_s, bn2_b = bn_fold(keys[4], keys[5], keys[6], keys[7], hid)
        bn3_s, bn3_b = bn_fold(keys[8], keys[9], keys[10], keys[11], oup)
        return dict(
            w1=0.3 * jax.random.normal(keys[12], (cin, hid), jnp.float32),
            w_dw=0.3 * jax.random.normal(keys[13], (k, k, hid), jnp.float32),
            w_se1=0.3 * jax.random.normal(keys[14], (hid, hid // 4), jnp.float32),
            w_se2=0.3 * jax.random.normal(keys[15], (hid // 4, hid), jnp.float32),
            w3=0.3 * jax.random.normal(keys[16], (hid, oup), jnp.float32),
            bn1_s=bn1_s, bn1_b=bn1_b, bn2_s=bn2_s, bn2_b=bn2_b,
            bn3_s=bn3_s, bn3_b=bn3_b)

    key = jax.random.PRNGKey(0)
    k0, k1, k2, k3 = jax.random.split(key, 4)
    # tolerance accounts for the bf16 MXU operands (f32 accumulation)
    ATOL = RTOL = 5e-2

    # Case 1: InvertedResidual(8, 16, 8, k=3, stride=1, SE, h_swish) -> identity branch
    B, Cin, H, W = 4, 8, 16, 16
    hid, oup, k, stride = 16, 8, 3, 1
    params1 = make_params(k0, Cin, hid, oup, k)
    x1 = jax.random.normal(k1, (B, Cin, H, W), jnp.float32)
    out1 = jax.block_until_ready(
        inverted_residual(x1, params1, kernel_size=k, stride=stride,
                          use_se=True, use_hs=True))
    ref1 = jax.block_until_ready(
        inverted_residual_ref(x1, params1, kernel_size=k, stride=stride,
                              use_se=True, use_hs=True))
    assert out1.shape == (B, oup, H, W), out1.shape
    assert jnp.allclose(out1, ref1, atol=ATOL, rtol=RTOL), \
        float(jnp.max(jnp.abs(out1 - ref1)))

    # Case 2: InvertedResidual(8, 16, 12, k=3, stride=2, SE, ReLU) -> strided, no identity
    hid2, oup2, stride2 = 16, 12, 2
    params2 = make_params(k2, Cin, hid2, oup2, k)
    x2 = jax.random.normal(k3, (B, Cin, H, W), jnp.float32)
    out2 = jax.block_until_ready(
        inverted_residual(x2, params2, kernel_size=k, stride=stride2,
                          use_se=True, use_hs=False))
    ref2 = jax.block_until_ready(
        inverted_residual_ref(x2, params2, kernel_size=k, stride=stride2,
                              use_se=True, use_hs=False))
    assert out2.shape == (B, oup2, H // 2, W // 2), out2.shape
    assert jnp.allclose(out2, ref2, atol=ATOL, rtol=RTOL), \
        float(jnp.max(jnp.abs(out2 - ref2)))

    print("KERNEL_OK")
</pallas_src>

<mosaic_0001>
module attributes {stable_mosaic.version = 11 : i64} {
  func.func @kernel(%arg0: i32, %arg1: memref<8x512xf32, #tpu.memory_space<vmem>>, %arg2: memref<16x8xbf16, #tpu.memory_space<vmem>>, %arg3: memref<16x1xf32, #tpu.memory_space<vmem>>, %arg4: memref<9x16x512xf32, #tpu.memory_space<vmem>>, %arg5: memref<16x1xf32, #tpu.memory_space<vmem>>, %arg6: memref<4x16xf32, #tpu.memory_space<vmem>>, %arg7: memref<16x4xf32, #tpu.memory_space<vmem>>, %arg8: memref<8x16xbf16, #tpu.memory_space<vmem>>, %arg9: memref<8x1xf32, #tpu.memory_space<vmem>>, %arg10: memref<8x512xf32, #tpu.memory_space<vmem>>) attributes {dimension_semantics = [#tpu.dimension_semantics<parallel>], iteration_bounds = array<i64: 2>, scalar_prefetch = 0 : i64, scratch_operands = 0 : i64, tpu.core_type = #tpu.core_type<tc>, window_params = [{transform_indices = @transform_0, window_bounds = array<i64: 8, 512>}, {pipeline_mode = #tpu.pipeline_mode<synchronous>, transform_indices = @transform_1, window_bounds = array<i64: 16, 8>}, {pipeline_mode = #tpu.pipeline_mode<synchronous>, transform_indices = @transform_2, window_bounds = array<i64: 16, 1>}, {pipeline_mode = #tpu.pipeline_mode<synchronous>, transform_indices = @transform_3, window_bounds = array<i64: 9, 16, 512>}, {pipeline_mode = #tpu.pipeline_mode<synchronous>, transform_indices = @transform_4, window_bounds = array<i64: 16, 1>}, {pipeline_mode = #tpu.pipeline_mode<synchronous>, transform_indices = @transform_5, window_bounds = array<i64: 4, 16>}, {pipeline_mode = #tpu.pipeline_mode<synchronous>, transform_indices = @transform_6, window_bounds = array<i64: 16, 4>}, {pipeline_mode = #tpu.pipeline_mode<synchronous>, transform_indices = @transform_7, window_bounds = array<i64: 8, 16>}, {pipeline_mode = #tpu.pipeline_mode<synchronous>, transform_indices = @transform_8, window_bounds = array<i64: 8, 1>}, {transform_indices = @transform_9, window_bounds = array<i64: 8, 512>}]} {
    %c0 = arith.constant 0 : index
    %c0_0 = arith.constant 0 : index
    %0 = vector.load %arg1[%c0, %c0_0] : memref<8x512xf32, #tpu.memory_space<vmem>>, vector<8x512xf32>
    %c0_1 = arith.constant 0 : index
    %c0_2 = arith.constant 0 : index
    %1 = vector.load %arg2[%c0_1, %c0_2] : memref<16x8xbf16, #tpu.memory_space<vmem>>, vector<16x8xbf16>
    %2 = arith.truncf %0 : vector<8x512xf32> to vector<8x512xbf16>
    %cst = arith.constant dense<0.000000e+00> : vector<16x512xf32>
    %3 = tpu.matmul %1, %2, %cst {dimension_numbers = #tpu.dot_dimension_numbers<[1], [0], [0], [1], [0, 0, 1, 1], [], []>} : vector<16x8xbf16>, vector<8x512xbf16>, vector<16x512xf32> -> vector<16x512xf32>
    %c0_3 = arith.constant 0 : index
    %c0_4 = arith.constant 0 : index
    %4 = vector.load %arg3[%c0_3, %c0_4] : memref<16x1xf32, #tpu.memory_space<vmem>>, vector<16x1xf32>
    %5 = vector.broadcast %4 : vector<16x1xf32> to vector<16x512xf32>
    %6 = arith.addf %3, %5 : vector<16x512xf32>
    %cst_5 = arith.constant 3.000000e+00 : f32
    %7 = vector.broadcast %cst_5 : f32 to vector<16x512xf32>
    %8 = arith.addf %6, %7 : vector<16x512xf32>
    %cst_6 = arith.constant 0.000000e+00 : f32
    %cst_7 = arith.constant 6.000000e+00 : f32
    %9 = vector.broadcast %cst_6 : f32 to vector<16x512xf32>
    %10 = arith.maximumf %9, %8 : vector<16x512xf32>
    %11 = vector.broadcast %cst_7 : f32 to vector<16x512xf32>
    %12 = arith.minimumf %11, %10 : vector<16x512xf32>
    %cst_8 = arith.constant 0.166666672 : f32
    %13 = vector.broadcast %cst_8 : f32 to vector<16x512xf32>
    %14 = arith.mulf %12, %13 : vector<16x512xf32>
    %15 = arith.mulf %6, %14 : vector<16x512xf32>
    %c17_i32 = arith.constant 17 : i32
    %16 = tpu.dynamic_rotate %15 by %c17_i32 dim 1 : vector<16x512xf32>, i32 -> vector<16x512xf32>
    %c0_9 = arith.constant 0 : index
    %c0_10 = arith.constant 0 : index
    %c0_11 = arith.constant 0 : index
    %17 = vector.load %arg4[%c0_9, %c0_10, %c0_11] : memref<9x16x512xf32, #tpu.memory_space<vmem>>, vector<1x16x512xf32>
    %18 = vector.shape_cast %17 : vector<1x16x512xf32> to vector<16x512xf32>
    %19 = arith.mulf %16, %18 : vector<16x512xf32>
    %c16_i32 = arith.constant 16 : i32
    %20 = tpu.dynamic_rotate %15 by %c16_i32 dim 1 : vector<16x512xf32>, i32 -> vector<16x512xf32>
    %c1 = arith.constant 1 : index
    %c0_12 = arith.constant 0 : index
    %c0_13 = arith.constant 0 : index
    %21 = vector.load %arg4[%c1, %c0_12, %c0_13] : memref<9x16x512xf32, #tpu.memory_space<vmem>>, vector<1x16x512xf32>
    %22 = vector.shape_cast %21 : vector<1x16x512xf32> to vector<16x512xf32>
    %23 = arith.mulf %20, %22 : vector<16x512xf32>
    %24 = arith.addf %19, %23 : vector<16x512xf32>
    %c15_i32 = arith.constant 15 : i32
    %25 = tpu.dynamic_rotate %15 by %c15_i32 dim 1 : vector<16x512xf32>, i32 -> vector<16x512xf32>
    %c2 = arith.constant 2 : index
    %c0_14 = arith.constant 0 : index
    %c0_15 = arith.constant 0 : index
    %26 = vector.load %arg4[%c2, %c0_14, %c0_15] : memref<9x16x512xf32, #tpu.memory_space<vmem>>, vector<1x16x512xf32>
    %27 = vector.shape_cast %26 : vector<1x16x512xf32> to vector<16x512xf32>
    %28 = arith.mulf %25, %27 : vector<16x512xf32>
    %29 = arith.addf %24, %28 : vector<16x512xf32>
    %c1_i32 = arith.constant 1 : i32
    %30 = tpu.dynamic_rotate %15 by %c1_i32 dim 1 : vector<16x512xf32>, i32 -> vector<16x512xf32>
    %c3 = arith.constant 3 : index
    %c0_16 = arith.constant 0 : index
    %c0_17 = arith.constant 0 : index
    %31 = vector.load %arg4[%c3, %c0_16, %c0_17] : memref<9x16x512xf32, #tpu.memory_space<vmem>>, vector<1x16x512xf32>
    %32 = vector.shape_cast %31 : vector<1x16x512xf32> to vector<16x512xf32>
    %33 = arith.mulf %30, %32 : vector<16x512xf32>
    %34 = arith.addf %29, %33 : vector<16x512xf32>
    %c4 = arith.constant 4 : index
    %c0_18 = arith.constant 0 : index
    %c0_19 = arith.constant 0 : index
    %35 = vector.load %arg4[%c4, %c0_18, %c0_19] : memref<9x16x512xf32, #tpu.memory_space<vmem>>, vector<1x16x512xf32>
    %36 = vector.shape_cast %35 : vector<1x16x512xf32> to vector<16x512xf32>
    %37 = arith.mulf %15, %36 : vector<16x512xf32>
    %38 = arith.addf %34, %37 : vector<16x512xf32>
    %c511_i32 = arith.constant 511 : i32
    %39 = tpu.dynamic_rotate %15 by %c511_i32 dim 1 : vector<16x512xf32>, i32 -> vector<16x512xf32>
    %c5 = arith.constant 5 : index
    %c0_20 = arith.constant 0 : index
    %c0_21 = arith.constant 0 : index
    %40 = vector.load %arg4[%c5, %c0_20, %c0_21] : memref<9x16x512xf32, #tpu.memory_space<vmem>>, vector<1x16x512xf32>
    %41 = vector.shape_cast %40 : vector<1x16x512xf32> to vector<16x512xf32>
    %42 = arith.mulf %39, %41 : vector<16x512xf32>
    %43 = arith.addf %38, %42 : vector<16x512xf32>
    %c497_i32 = arith.constant 497 : i32
    %44 = tpu.dynamic_rotate %15 by %c497_i32 dim 1 : vector<16x512xf32>, i32 -> vector<16x512xf32>
    %c6 = arith.constant 6 : index
    %c0_22 = arith.constant 0 : index
    %c0_23 = arith.constant 0 : index
    %45 = vector.load %arg4[%c6, %c0_22, %c0_23] : memref<9x16x512xf32, #tpu.memory_space<vmem>>, vector<1x16x512xf32>
    %46 = vector.shape_cast %45 : vector<1x16x512xf32> to vector<16x512xf32>
    %47 = arith.mulf %44, %46 : vector<16x512xf32>
    %48 = arith.addf %43, %47 : vector<16x512xf32>
    %c496_i32 = arith.constant 496 : i32
    %49 = tpu.dynamic_rotate %15 by %c496_i32 dim 1 : vector<16x512xf32>, i32 -> vector<16x512xf32>
    %c7 = arith.constant 7 : index
    %c0_24 = arith.constant 0 : index
    %c0_25 = arith.constant 0 : index
    %50 = vector.load %arg4[%c7, %c0_24, %c0_25] : memref<9x16x512xf32, #tpu.memory_space<vmem>>, vector<1x16x512xf32>
    %51 = vector.shape_cast %50 : vector<1x16x512xf32> to vector<16x512xf32>
    %52 = arith.mulf %49, %51 : vector<16x512xf32>
    %53 = arith.addf %48, %52 : vector<16x512xf32>
    %c495_i32 = arith.constant 495 : i32
    %54 = tpu.dynamic_rotate %15 by %c495_i32 dim 1 : vector<16x512xf32>, i32 -> vector<16x512xf32>
    %c8 = arith.constant 8 : index
    %c0_26 = arith.constant 0 : index
    %c0_27 = arith.constant 0 : index
    %55 = vector.load %arg4[%c8, %c0_26, %c0_27] : memref<9x16x512xf32, #tpu.memory_space<vmem>>, vector<1x16x512xf32>
    %56 = vector.shape_cast %55 : vector<1x16x512xf32> to vector<16x512xf32>
    %57 = arith.mulf %54, %56 : vector<16x512xf32>
    %58 = arith.addf %53, %57 : vector<16x512xf32>
    %c0_28 = arith.constant 0 : index
    %c0_29 = arith.constant 0 : index
    %59 = vector.load %arg5[%c0_28, %c0_29] : memref<16x1xf32, #tpu.memory_space<vmem>>, vector<16x1xf32>
    %60 = vector.broadcast %59 : vector<16x1xf32> to vector<16x512xf32>
    %61 = arith.addf %58, %60 : vector<16x512xf32>
    %62 = tpu.iota {dimensions = array<i32: 1>} : vector<2x512xi32>
    %63 = tpu.iota {dimensions = array<i32: 0>} : vector<2x512xi32>
    %c256_i32 = arith.constant 256 : i32
    %64 = vector.broadcast %c256_i32 : i32 to vector<2x512xi32>
    %65 = arith.muli %63, %64 : vector<2x512xi32>
    %66 = arith.cmpi sge, %62, %65 : vector<2x512xi32>
    %c256_i32_30 = arith.constant 256 : i32
    %67 = vector.broadcast %c256_i32_30 : i32 to vector<2x512xi32>
    %68 = arith.addi %65, %67 : vector<2x512xi32>
    %69 = arith.cmpi slt, %62, %68 : vector<2x512xi32>
    %70 = arith.andi %66, %69 : vector<2x512xi1>
    %71 = arith.extui %70 : vector<2x512xi1> to vector<2x512xi32>
    %72 = arith.sitofp %71 : vector<2x512xi32> to vector<2x512xf32>
    %73 = tpu.iota {dimensions = array<i32: 0>} : vector<512x2xi32>
    %74 = tpu.iota {dimensions = array<i32: 1>} : vector<512x2xi32>
    %c256_i32_31 = arith.constant 256 : i32
    %75 = vector.broadcast %c256_i32_31 : i32 to vector<512x2xi32>
    %76 = arith.muli %74, %75 : vector<512x2xi32>
    %77 = arith.cmpi sge, %73, %76 : vector<512x2xi32>
    %c256_i32_32 = arith.constant 256 : i32
    %78 = vector.broadcast %c256_i32_32 : i32 to vector<512x2xi32>
    %79 = arith.addi %76, %78 : vector<512x2xi32>
    %80 = arith.cmpi slt, %73, %79 : vector<512x2xi32>
    %81 = arith.andi %77, %80 : vector<512x2xi1>
    %82 = arith.extui %81 : vector<512x2xi1> to vector<512x2xi32>
    %83 = arith.sitofp %82 : vector<512x2xi32> to vector<512x2xf32>
    %cst_33 = arith.constant dense<0.000000e+00> : vector<16x2xf32>
    %84 = tpu.matmul %61, %83, %cst_33 {dimension_numbers = #tpu.dot_dimension_numbers<[1], [0], [0], [1], [0, 0, 1, 1], [], []>} : vector<16x512xf32>, vector<512x2xf32>, vector<16x2xf32> -> vector<16x2xf32>
    %cst_34 = arith.constant 3.906250e-03 : f32
    %85 = vector.broadcast %cst_34 : f32 to vector<16x2xf32>
    %86 = arith.mulf %84, %85 : vector<16x2xf32>
    %c0_35 = arith.constant 0 : index
    %c0_36 = arith.constant 0 : index
    %87 = vector.load %arg6[%c0_35, %c0_36] : memref<4x16xf32, #tpu.memory_space<vmem>>, vector<4x16xf32>
    %cst_37 = arith.constant dense<0.000000e+00> : vector<4x2xf32>
    %88 = tpu.matmul %87, %86, %cst_37 {dimension_numbers = #tpu.dot_dimension_numbers<[1], [0], [0], [1], [0, 0, 1, 1], [], []>} : vector<4x16xf32>, vector<16x2xf32>, vector<4x2xf32> -> vector<4x2xf32>
    %cst_38 = arith.constant 0.000000e+00 : f32
    %89 = vector.broadcast %cst_38 : f32 to vector<4x2xf32>
    %90 = arith.maximumf %88, %89 : vector<4x2xf32>
    %c0_39 = arith.constant 0 : index
    %c0_40 = arith.constant 0 : index
    %91 = vector.load %arg7[%c0_39, %c0_40] : memref<16x4xf32, #tpu.memory_space<vmem>>, vector<16x4xf32>
    %cst_41 = arith.constant dense<0.000000e+00> : vector<16x2xf32>
    %92 = tpu.matmul %91, %90, %cst_41 {dimension_numbers = #tpu.dot_dimension_numbers<[1], [0], [0], [1], [0, 0, 1, 1], [], []>} : vector<16x4xf32>, vector<4x2xf32>, vector<16x2xf32> -> vector<16x2xf32>
    %cst_42 = arith.constant 3.000000e+00 : f32
    %93 = vector.broadcast %cst_42 : f32 to vector<16x2xf32>
    %94 = arith.addf %92, %93 : vector<16x2xf32>
    %cst_43 = arith.constant 0.000000e+00 : f32
    %cst_44 = arith.constant 6.000000e+00 : f32
    %95 = vector.broadcast %cst_43 : f32 to vector<16x2xf32>
    %96 = arith.maximumf %95, %94 : vector<16x2xf32>
    %97 = vector.broadcast %cst_44 : f32 to vector<16x2xf32>
    %98 = arith.minimumf %97, %96 : vector<16x2xf32>
    %cst_45 = arith.constant 0.166666672 : f32
    %99 = vector.broadcast %cst_45 : f32 to vector<16x2xf32>
    %100 = arith.mulf %98, %99 : vector<16x2xf32>
    %cst_46 = arith.constant dense<0.000000e+00> : vector<16x512xf32>
    %101 = tpu.matmul %100, %72, %cst_46 {dimension_numbers = #tpu.dot_dimension_numbers<[1], [0], [0], [1], [0, 0, 1, 1], [], []>} : vector<16x2xf32>, vector<2x512xf32>, vector<16x512xf32> -> vector<16x512xf32>
    %102 = arith.mulf %61, %101 : vector<16x512xf32>
    %cst_47 = arith.constant 3.000000e+00 : f32
    %103 = vector.broadcast %cst_47 : f32 to vector<16x512xf32>
    %104 = arith.addf %102, %103 : vector<16x512xf32>
    %cst_48 = arith.constant 0.000000e+00 : f32
    %cst_49 = arith.constant 6.000000e+00 : f32
    %105 = vector.broadcast %cst_48 : f32 to vector<16x512xf32>
    %106 = arith.maximumf %105, %104 : vector<16x512xf32>
    %107 = vector.broadcast %cst_49 : f32 to vector<16x512xf32>
    %108 = arith.minimumf %107, %106 : vector<16x512xf32>
    %cst_50 = arith.constant 0.166666672 : f32
    %109 = vector.broadcast %cst_50 : f32 to vector<16x512xf32>
    %110 = arith.mulf %108, %109 : vector<16x512xf32>
    %111 = arith.mulf %102, %110 : vector<16x512xf32>
    %c0_51 = arith.constant 0 : index
    %c0_52 = arith.constant 0 : index
    %112 = vector.load %arg8[%c0_51, %c0_52] : memref<8x16xbf16, #tpu.memory_space<vmem>>, vector<8x16xbf16>
    %113 = arith.truncf %111 : vector<16x512xf32> to vector<16x512xbf16>
    %cst_53 = arith.constant dense<0.000000e+00> : vector<8x512xf32>
    %114 = tpu.matmul %112, %113, %cst_53 {dimension_numbers = #tpu.dot_dimension_numbers<[1], [0], [0], [1], [0, 0, 1, 1], [], []>} : vector<8x16xbf16>, vector<16x512xbf16>, vector<8x512xf32> -> vector<8x512xf32>
    %c0_54 = arith.constant 0 : index
    %c0_55 = arith.constant 0 : index
    %115 = vector.load %arg9[%c0_54, %c0_55] : memref<8x1xf32, #tpu.memory_space<vmem>>, vector<8x1xf32>
    %116 = vector.broadcast %115 : vector<8x1xf32> to vector<8x512xf32>
    %117 = arith.addf %114, %116 : vector<8x512xf32>
    %118 = arith.addf %117, %0 : vector<8x512xf32>
    %c0_56 = arith.constant 0 : index
    %c0_57 = arith.constant 0 : index
    %119 = vector.load %arg10[%c0_56, %c0_57] : memref<8x512xf32, #tpu.memory_space<vmem>>, vector<8x512xf32>
    tpu.vector_store %arg10[%c0_56, %c0_57], %118 {strides = array<i32>} : memref<8x512xf32, #tpu.memory_space<vmem>>, vector<8x512xf32>,
    return
  }
  func.func @transform_0(%arg0: i32) -> (i32, i32) {
    %c0_i32 = arith.constant 0 : i32
    %c0_i32_0 = arith.constant 0 : i32
    return %c0_i32, %arg0 : i32, i32
  }
  func.func @transform_1(%arg0: i32) -> (i32, i32) {
    %c0_i32 = arith.constant 0 : i32
    %c0_i32_0 = arith.constant 0 : i32
    %c0_i32_1 = arith.constant 0 : i32
    return %c0_i32, %c0_i32_0 : i32, i32
  }
  func.func @transform_2(%arg0: i32) -> (i32, i32) {
    %c0_i32 = arith.constant 0 : i32
    %c0_i32_0 = arith.constant 0 : i32
    %c0_i32_1 = arith.constant 0 : i32
    return %c0_i32, %c0_i32_0 : i32, i32
  }
  func.func @transform_3(%arg0: i32) -> (i32, i32, i32) {
    %c0_i32 = arith.constant 0 : i32
    %c0_i32_0 = arith.constant 0 : i32
    %c0_i32_1 = arith.constant 0 : i32
    %c0_i32_2 = arith.constant 0 : i32
    return %c0_i32, %c0_i32_0, %c0_i32_1 : i32, i32, i32
  }
  func.func @transform_4(%arg0: i32) -> (i32, i32) {
    %c0_i32 = arith.constant 0 : i32
    %c0_i32_0 = arith.constant 0 : i32
    %c0_i32_1 = arith.constant 0 : i32
    return %c0_i32, %c0_i32_0 : i32, i32
  }
  func.func @transform_5(%arg0: i32) -> (i32, i32) {
    %c0_i32 = arith.constant 0 : i32
    %c0_i32_0 = arith.constant 0 : i32
    %c0_i32_1 = arith.constant 0 : i32
    return %c0_i32, %c0_i32_0 : i32, i32
  }
  func.func @transform_6(%arg0: i32) -> (i32, i32) {
    %c0_i32 = arith.constant 0 : i32
    %c0_i32_0 = arith.constant 0 : i32
    %c0_i32_1 = arith.constant 0 : i32
    return %c0_i32, %c0_i32_0 : i32, i32
  }
  func.func @transform_7(%arg0: i32) -> (i32, i32) {
    %c0_i32 = arith.constant 0 : i32
    %c0_i32_0 = arith.constant 0 : i32
    %c0_i32_1 = arith.constant 0 : i32
    return %c0_i32, %c0_i32_0 : i32, i32
  }
  func.func @transform_8(%arg0: i32) -> (i32, i32) {
    %c0_i32 = arith.constant 0 : i32
    %c0_i32_0 = arith.constant 0 : i32
    %c0_i32_1 = arith.constant 0 : i32
    return %c0_i32, %c0_i32_0 : i32, i32
  }
  func.func @transform_9(%arg0: i32) -> (i32, i32) {
    %c0_i32 = arith.constant 0 : i32
    %c0_i32_0 = arith.constant 0 : i32
    return %c0_i32, %arg0 : i32, i32
  }
}

</mosaic_0001>

<bundles_post_ra>
// kernel: tpu_custom_call.1
= control target key start
LH: loop header
LB: loop body
LE: loop exit
PB: predicated region body
PF: predicated region fallthrough
CT: control target
= control target key end

     0   :  { %14 = vsyncpa [#allocation3], 0  ;;  %s3665_s0 = inlined_call_operand.vmem [shape: f32[8,1024], index: 0, kind: input, shape index: {}]   ;;  %s3666_s1 = inlined_call_operand.vmem [shape: bf16[16,8], index: 1, kind: input, shape index: {}]   ;;  %s3667_s2 = inlined_call_operand.vmem [shape: f32[16,1], index: 2, kind: input, shape index: {}]   ;;  %s3668_s3 = inlined_call_operand.hbm [shape: f32[9,16,512], index: 3, kind: input, shape index: {}]   ;;  %s3669_s4 = inlined_call_operand.vmem [shape: f32[16,1], index: 4, kind: input, shape index: {}]   ;;  %s3670_s5 = inlined_call_operand.vmem [shape: f32[4,16], index: 5, kind: input, shape index: {}]   ;;  %s3671_s6 = inlined_call_operand.vmem [shape: f32[16,4], index: 6, kind: input, shape index: {}]   ;;  %s3672_s7 = inlined_call_operand.vmem [shape: bf16[8,16], index: 7, kind: input, shape index: {}]   ;;  %s3673_s8 = inlined_call_operand.vmem [shape: f32[8,1], index: 8, kind: input, shape index: {}]   ;;  %s3674_s9 = inlined_call_operand.hbm [shape: f32[8,1024], index: 9, kind: output, shape index: {}]  }
   0x1   :  { %15 = vsyncpa [#allocation4], 0 }
   0x2   :  { %17 = vsyncpa [#allocation4 + $0x1], 0  ;;  %s2592_s30 = smov 0   ;;  %s2594_s10 = smov 0  }
   0x3   :  { %s2596_s11 = smov 0   ;;  %s2598_s12 = smov 0  }
   0x4 LB: > { %s2613_s13 = sadd.s32 4294967295, %s2524_s12   ;;  %s2103_s14 = sadd.s32 4294967294, %s2524_s12   ;;  %s2524_s12 = sphi %s2598_s12, %s3682_s12   ;;  %s2520_s11 = sphi %s2596_s11, %s3681_s11   ;;  %s2516_s10 = sphi %s2594_s10, %s3680_s10   ;;  %s2512_s30 = sphi %s2592_s30, %s3679_s30  }
   0x5   : > { %s2617_s15 = sadd.s32 1, %s2524_s12   ;;  %s224_s16 = sadd.s32 1, %s2520_s11 }
   0x6   : > { %s221_s17 = ssub.s32 %s2524_s12, %s2617_s15  ;;  %p234_p0 = scmp.ne.s32.totalorder %s2520_s11, %s2516_s10 }
   0x7   : > { %p222_p1 = scmp.eq.s32.totalorder %s221_s17, 0  ;;  %p235_p2 = scmp.eq.s32.totalorder %s2613_s13, 1 }
   0x8   : > { %p240_p3 = scmp.ne.s32.totalorder %s2516_s10, %s2512_s30  ;;  %p241_p4 = scmp.eq.s32.totalorder %s2103_s14, 1 }
   0x9   : > { %s2628_s18 = scalar_select %p222_p1, %s2520_s11, %s224_s16  }
   0xa   : > { %p2630_p5 = por %p235_p2, %p234_p0  ;;  %p2634_p6 = por %p241_p4, %p240_p3 }
   0xb   : > { %p2104_p7 = scmp.ge.s32.totalorder %s2524_s12, 1  ;;  %p248_p8 = scmp.lt.s32.totalorder %s2524_s12, 3 }
   0xc   : > { %s3676_s20 = scalar_select %p2634_p6, 1, 0 }
   0xd   : > { %p2377_p9 = scmp.eq.s32.totalorder %s2613_s13, 0  ;;  %p2641_p10 = pnand %p2104_p7, %p248_p8 }
   0xe   : > { %s2526_s22 = smov [#allocation2]  }
   0xf   : > { %s266_s23 = sshll.u32 %s2526_s22, 4  ;;  %p2369_p11 = pneg %p2641_p10  ;;  %s267_s23 = int_to_ptr.vmem [resolvable:$true] %s266_s23 }
  0x10   : > { %s2445_s24 = scalar_lea.vmem %s267_s23, 9216  ;;  %p2453_p3 = scmp.lt.s32.totalorder %s267_s23, %s267_s23 }
  0x11   : > { %p2370_p12 = pnand %p2377_p9, %p2369_p11  ;;  %p2446_p0 = scmp.ne.s32.totalorder %s267_s23, %s2445_s24 }
  0x12   : > { %p2454_p4 = scmp.lt.s32.totalorder %s2445_s24, %s2445_s24 }
  0x13   : > { %p2436_p13 = pneg %p2370_p12 }
  0x14   : > { %p2455_p6 = por %p2454_p4, %p2453_p3 }
  0x15   : > { %p2448_p1 = pnand %p2446_p0, %p2436_p13 }
  0x17   : > { %p2449_p2 = pneg %p2448_p1 }
  0x19   : > { %p2456_p7 = pnand %p2455_p6, %p2449_p2 }
  0x1b   : > { %2459 = shalt.err (!%p2456_p7)
}
  0x1c   : > { %s2527_s25 = smov 512   ;;  %s2528_s26 = smov 32  }
  0x1d   : > { %2372 = dma.hbm_to_vmem [thread:$0]  (!%p2370_p12), %s3668_s3, 9216, %s267_s23, [#allocation3], %s2527_s25, %s2527_s25, %s2528_s26  }
  0x1e   : > { %306 = sbr.rel (%p2641_p10) target bundleno = 1547 (0x60b), region = 56 }
  0x23   : > { %2503 = dma.done.wait (%p2377_p9), [#allocation3], 9216  }
  0x24   : > { %2505 = vsyncadd (%p2377_p9), [#allocation3], 4294958080  ;;  %s2110_s29 = sshll.u32 %s2613_s13, 2  ;;  %v2529_v0 = vmov 0   ;;  %vm381_vm0 = vcmask 1043456   ;;  %v360_v9 = vld [vmem:[%s3667_s2] sm:$0xff]  ;;  %v536_v44 = vlaneseq }
  0x25   : > { %p343_p8 = scmp.lt.s32.totalorder %s2110_s29, 7  ;;  %426 = vmatprep.mubr.bf16.mxu0 %v2529_v0  ;;  %469 = vmatprep.mubr.bf16.mxu1 %v2529_v0  ;;  %v2429_v11 = vld [vmem:[%s3666_s1] sm:$0xff]   ;;  %vm377_vm1 = vcmask 64512   ;;  %v361_v13 = vld [vmem:[%s3667_s2 + $0x8] sm:$0xff]  ;;  %s2531_s16 = smov 16   ;;  %v2534_v52 = vmov 1.0  }
  0x26   : > { %2427 = vset.pattern.permute.xlu0 %v2529_v0  ;;  %2428 = vset.pattern.permute.xlu1 %v2529_v0  ;;  %v938_v14 = vld [vmem:[%s3669_s4] sm:$0xff]  ;;  %s2532_s17 = smov 15   ;;  %v2712_v45 = vand.u32 127, %v536_v44  ;;  %v2716_v46 = vshrl.u32 %v536_v44, 7  ;;  %s2533_s22 = smov 1  }
  0x27   : > { %s3684_s29 = smov (!%p343_p8, %s2110_s29), 7  ;;  %364 = vperm.xlu0 %2427, %v360_v9   ;;  %s2535_s23 = smov 127  }
  0x28   : > { %s2111_s14 = sshll.u32 %s3684_s29, 3  ;;  %v2719_v47 = vmul.u32 256, %v2712_v45  ;;  %v1015_v48 = vadd.s32 248, %v2716_v46  ;;  %v999_v50 = vadd.s32 120, %v2716_v46  ;;  %v1014_v51 = vadd.s32 240, %v2716_v46  ;;  %s2536_s24 = smov 113  }
  0x29   : > { %s2666_s21 = scalar_lea.vmem %s3665_s0, %s2111_s14  ;;  %s2530_s14 = smov 17   ;;  %v998_v53 = vadd.s32 112, %v2716_v46  ;;  %v1013_v54 = vadd.s32 232, %v2716_v46  ;;  %v1047_v55 = vadd.s32 504, %v2716_v46  ;;  %v997_v56 = vadd.s32 104, %v2716_v46 }
  0x2a   : > { %v351_v1 = vld [vmem:[%s2666_s21 + $0x8] sm:$0xff]  ;;  %v353_v2 = vld [vmem:[%s2666_s21 + $0x18] sm:$0xff]  ;;  %v350_v3 = vld [vmem:[%s2666_s21] sm:$0xff]  ;;  %v2727_v49 = vadd.s32 256, %v2719_v47  ;;  %vm1080_vm2 = vcmp.ge.s32.totalorder %v1015_v48, %v2719_v47  ;;  %vm1064_vm5 = vcmp.ge.s32.totalorder %v999_v50, %v2719_v47  ;;  %vm1079_vm8 = vcmp.ge.s32.totalorder %v1014_v51, %v2719_v47  ;;  %s2537_s25 = smov 112   ;;  %s2538_s26 = smov 111  }
  0x2b   : > { %v357_v4 = vpack.c.bf16 %v351_v1, %v351_v1  ;;  %v359_v5 = vpack.c.bf16 %v353_v2, %v353_v2  ;;  %v356_v6 = vpack.c.bf16 %v350_v3, %v350_v3  ;;  %v352_v7 = vld [vmem:[%s2666_s21 + $0x10] sm:$0xff]  ;;  %369 = vperm.xlu0 %2427, %v361_v13   ;;  %vm1063_vm11 = vcmp.ge.s32.totalorder %v998_v53, %v2719_v47  ;;  %s339_s28 = sand.u32 1, %s2516_s10  }
  0x2c   : > { %v358_v8 = vpack.c.bf16 %v352_v7, %v352_v7  ;;  %vm1145_vm3 = vcmp.lt.s32.totalorder %v1015_v48, %v2727_v49  ;;  %vm1129_vm6 = vcmp.lt.s32.totalorder %v999_v50, %v2727_v49  ;;  %vm1144_vm9 = vcmp.lt.s32.totalorder %v1014_v51, %v2727_v49  ;;  %s2109_s29 = sshll.u32 %s339_s28, 5 }
  0x2d   : > { %2113 = vmatprep.subr.msk.bf16.mxu0 %vm381_vm0, %v357_v4  ;;  %2115 = vmatprep.subr.msk.bf16.mxu1 %vm381_vm0, %v359_v5  ;;  %v383_v10 = vsel %vm381_vm0, %v356_v6, 0  ;;  %vm1209_vm4 = vmand %vm1080_vm2, %vm1145_vm3  ;;  %vm1128_vm12 = vcmp.lt.s32.totalorder %v998_v53, %v2727_v49  ;;  %v1031_v57 = vadd.s32 376, %v2716_v46  ;;  %vm1078_vm14 = vcmp.ge.s32.totalorder %v1013_v54, %v2719_v47 }
  0x2e   : > { %409 = vmatpush1.bf16.msra.mxu0 %v383_v10  ;;  %v389_v12 = vsel %vm381_vm0, %v358_v8, 0  ;;  %vm1193_vm7 = vmand %vm1064_vm5, %vm1129_vm6  ;;  %vm1143_vm15 = vcmp.lt.s32.totalorder %v1013_v54, %v2727_v49  ;;  %vm1177_vm2 = vcmp.lt.s32.totalorder %v1047_v55, %v2727_v49  ;;  %vm1127_vm5 = vcmp.lt.s32.totalorder %v997_v56, %v2727_v49 }
  0x2f   : > { %452 = vmatpush1.bf16.msra.mxu1 %v389_v12  ;;  %942 = vperm.xlu0 %2427, %v938_v14   ;;  %vm1208_vm10 = vmand %vm1079_vm8, %vm1144_vm9  ;;  %vm1096_vm6 = vcmp.ge.s32.totalorder %v1031_v57, %v2719_v47  ;;  %v1012_v58 = vadd.s32 224, %v2716_v46  ;;  %vm1161_vm8 = vcmp.lt.s32.totalorder %v1031_v57, %v2727_v49  ;;  %v1046_v59 = vadd.s32 496, %v2716_v46 }
  0x30   : > { %2269 = vmatprep.subr.msk.mxu0 %vm1209_vm4, %v2534_v52  ;;  %vm1192_vm13 = vmand %vm1063_vm11, %vm1128_vm12  ;;  %vm1062_vm4 = vcmp.ge.s32.totalorder %v997_v56, %v2719_v47  ;;  %v996_v60 = vadd.s32 96, %v2716_v46  ;;  %v1030_v61 = vadd.s32 368, %v2716_v46  ;;  %v1011_v62 = vadd.s32 216, %v2716_v46 }
  0x31   : > { %2114 = vmatmul.mubr.msk.bf16.vlgmr.msra.gmra.mxu0 %vm377_vm1, %v2429_v11  ;;  %vm1207_vm3 = vmand %vm1078_vm14, %vm1143_vm15  ;;  %vm1142_vm11 = vcmp.lt.s32.totalorder %v1012_v58, %v2727_v49  ;;  %v1045_v63 = vadd.s32 488, %v2716_v46  ;;  %vm1176_vm14 = vcmp.lt.s32.totalorder %v1046_v59, %v2727_v49  ;;  %v995_v1 = vadd.s32 88, %v2716_v46 }
  0x32   : > { %2116 = vmatmul.mubr.msk.bf16.vlgmr.msra.gmra.mxu1 %vm377_vm1, %v2429_v11  ;;  %2270 = vmatpush3.msk.msra.mxu0 %vm1193_vm7, %v2534_v52  ;;  %vm1112_vm1 = vcmp.ge.s32.totalorder %v1047_v55, %v2719_v47  ;;  %vm1191_vm9 = vmand %vm1062_vm4, %vm1127_vm5  ;;  %vm1061_vm15 = vcmp.ge.s32.totalorder %v996_v60, %v2719_v47  ;;  %vm1160_vm4 = vcmp.lt.s32.totalorder %v1030_v61, %v2727_v49  ;;  %v1029_v2 = vadd.s32 360, %v2716_v46 }
  0x33   : > { %2271 = vmatprep.subr.msk.mxu0 %vm1208_vm10, %v2534_v52  ;;  %vm1241_vm7 = vmand %vm1112_vm1, %vm1177_vm2  ;;  %vm1077_vm10 = vcmp.ge.s32.totalorder %v1012_v58, %v2719_v47  ;;  %vm1126_vm1 = vcmp.lt.s32.totalorder %v996_v60, %v2727_v49  ;;  %v1010_v3 = vadd.s32 208, %v2716_v46  ;;  %v1044_v4 = vadd.s32 480, %v2716_v46 }
  0x34   : > { %2272 = vmatpush3.msk.msra.mxu0 %vm1192_vm13, %v2534_v52  ;;  %2307 = vmatprep.subr.msk.mxu1 %vm1241_vm7, %v2534_v52  ;;  %vm1225_vm12 = vmand %vm1096_vm6, %vm1161_vm8  ;;  %vm1111_vm13 = vcmp.ge.s32.totalorder %v1046_v59, %v2719_v47  ;;  %vm1076_vm6 = vcmp.ge.s32.totalorder %v1011_v62, %v2719_v47  ;;  %vm1141_vm7 = vcmp.lt.s32.totalorder %v1011_v62, %v2727_v49  ;;  %v994_v5 = vadd.s32 80, %v2716_v46 }
  0x35   : > { %2273 = vmatprep.subr.msk.mxu0 %vm1207_vm3, %v2534_v52  ;;  %2308 = vmatpush3.msk.msra.mxu1 %vm1225_vm12, %v2534_v52  ;;  %vm1206_vm2 = vmand %vm1077_vm10, %vm1142_vm11  ;;  %vm1095_vm3 = vcmp.ge.s32.totalorder %v1030_v61, %v2719_v47  ;;  %vm1110_vm8 = vcmp.ge.s32.totalorder %v1045_v63, %v2719_v47  ;;  %vm1175_vm10 = vcmp.lt.s32.totalorder %v1045_v63, %v2727_v49  ;;  %v1028_v7 = vadd.s32 352, %v2716_v46 }
  0x36   : > { %2274 = vmatpush3.msk.msra.mxu0 %vm1191_vm9, %v2534_v52  ;;  %vm1240_vm5 = vmand %vm1111_vm13, %vm1176_vm14  ;;  %vm1060_vm12 = vcmp.ge.s32.totalorder %v995_v1, %v2719_v47  ;;  %vm1125_vm13 = vcmp.lt.s32.totalorder %v995_v1, %v2727_v49  ;;  %v1009_v8 = vadd.s32 200, %v2716_v46  ;;  %v1043_v10 = vadd.s32 472, %v2716_v46 }
  0x37   : > { %2275 = vmatprep.subr.msk.mxu0 %vm1206_vm2, %v2534_v52  ;;  %2309 = vmatprep.subr.msk.mxu1 %vm1240_vm5, %v2534_v52  ;;  %vm1190_vm9 = vmand %vm1061_vm15, %vm1126_vm1  ;;  %vm1094_vm15 = vcmp.ge.s32.totalorder %v1029_v2, %v2719_v47  ;;  %vm1159_vm1 = vcmp.lt.s32.totalorder %v1029_v2, %v2727_v49  ;;  %v993_v13 = vadd.s32 72, %v2716_v46  ;;  %v1027_v14 = vadd.s32 344, %v2716_v46 }
  0x38   : > { %2276 = vmatpush3.msk.msra.mxu0 %vm1190_vm9, %v2534_v52  ;;  %vm1224_vm11 = vmand %vm1095_vm3, %vm1160_vm4  ;;  %vm1075_vm3 = vcmp.ge.s32.totalorder %v1010_v3, %v2719_v47  ;;  %vm1140_vm4 = vcmp.lt.s32.totalorder %v1010_v3, %v2727_v49  ;;  %vm1059_vm9 = vcmp.ge.s32.totalorder %v994_v5, %v2719_v47  ;;  %v1038_v48 = vadd.s32 432, %v2716_v46 }
  0x39   : > { %2310 = vmatpush3.msk.msra.mxu1 %vm1224_vm11, %v2534_v52  ;;  %vm1205_vm14 = vmand %vm1076_vm6, %vm1141_vm7  ;;  %vm1109_vm6 = vcmp.ge.s32.totalorder %v1044_v4, %v2719_v47  ;;  %vm1174_vm7 = vcmp.lt.s32.totalorder %v1044_v4, %v2727_v49  ;;  %v988_v53 = vadd.s32 32, %v2716_v46  ;;  %v1022_v54 = vadd.s32 304, %v2716_v46 }
  0x3a   : > { %2277 = vmatprep.subr.msk.mxu0 %vm1205_vm14, %v2534_v52  ;;  %vm1239_vm2 = vmand %vm1110_vm8, %vm1175_vm10  ;;  %vm1124_vm10 = vcmp.lt.s32.totalorder %v994_v5, %v2727_v49  ;;  %v1003_v55 = vadd.s32 152, %v2716_v46  ;;  %v1037_v58 = vadd.s32 424, %v2716_v46  ;;  %v987_v60 = vadd.s32 24, %v2716_v46 }
  0x3b   : > { %2311 = vmatprep.subr.msk.mxu1 %vm1239_vm2, %v2534_v52  ;;  %vm1189_vm5 = vmand %vm1060_vm12, %vm1125_vm13  ;;  %vm1093_vm12 = vcmp.ge.s32.totalorder %v1028_v7, %v2719_v47  ;;  %vm1158_vm13 = vcmp.lt.s32.totalorder %v1028_v7, %v2727_v49  ;;  %v1021_v61 = vadd.s32 296, %v2716_v46  ;;  %v1002_v63 = vadd.s32 144, %v2716_v46 }
  0x3c   : > { %2278 = vmatpush3.msk.msra.mxu0 %vm1189_vm5, %v2534_v52  ;;  %vm1223_vm8 = vmand %vm1094_vm15, %vm1159_vm1  ;;  %vm1074_vm15 = vcmp.ge.s32.totalorder %v1009_v8, %v2719_v47  ;;  %vm1139_vm1 = vcmp.lt.s32.totalorder %v1009_v8, %v2727_v49  ;;  %v1036_v2 = vadd.s32 416, %v2716_v46  ;;  %v986_v3 = vadd.s32 16, %v2716_v46 }
  0x3d   : > { %2312 = vmatpush3.msk.msra.mxu1 %vm1223_vm8, %v2534_v52  ;;  %vm1204_vm11 = vmand %vm1075_vm3, %vm1140_vm4  ;;  %vm1108_vm3 = vcmp.ge.s32.totalorder %v1043_v10, %v2719_v47  ;;  %vm1173_vm4 = vcmp.lt.s32.totalorder %v1043_v10, %v2727_v49  ;;  %v1020_v4 = vadd.s32 288, %v2716_v46  ;;  %v1035_v8 = vadd.s32 408, %v2716_v46 }
  0x3e   : > { %2279 = vmatprep.subr.msk.mxu0 %vm1204_vm11, %v2534_v52  ;;  %vm1238_vm14 = vmand %vm1109_vm6, %vm1174_vm7  ;;  %vm1058_vm6 = vcmp.ge.s32.totalorder %v993_v13, %v2719_v47  ;;  %vm1123_vm7 = vcmp.lt.s32.totalorder %v993_v13, %v2727_v49  ;;  %v1019_v10 = vadd.s32 280, %v2716_v46 }
  0x3f   : > { %2313 = vmatprep.subr.msk.mxu1 %vm1238_vm14, %v2534_v52  ;;  %vm1188_vm2 = vmand %vm1059_vm9, %vm1124_vm10  ;;  %vm1092_vm9 = vcmp.ge.s32.totalorder %v1027_v14, %v2719_v47  ;;  %vm1157_vm10 = vcmp.lt.s32.totalorder %v1027_v14, %v2727_v49  ;;  %v1034_v14 = vadd.s32 400, %v2716_v46 }
  0x40   : > { %2280 = vmatpush3.msk.msra.mxu0 %vm1188_vm2, %v2534_v52  ;;  %vm1222_vm5 = vmand %vm1093_vm12, %vm1158_vm13 }
  0x41   : > { %2314 = vmatpush3.msk.msra.mxu1 %vm1222_vm5, %v2534_v52  ;;  %vm1203_vm8 = vmand %vm1074_vm15, %vm1139_vm1 }
  0x42   : > { %2281 = vmatprep.subr.msk.mxu0 %vm1203_vm8, %v2534_v52  ;;  %vm1237_vm11 = vmand %vm1108_vm3, %vm1173_vm4 }
  0x43   : > { %2315 = vmatprep.subr.msk.mxu1 %vm1237_vm11, %v2534_v52  ;;  %vm1187_vm14 = vmand %vm1058_vm6, %vm1123_vm7 }
  0x44   : > { %2282 = vmatpush3.msk.msra.mxu0 %vm1187_vm14, %v2534_v52  ;;  %vm1221_vm2 = vmand %vm1092_vm9, %vm1157_vm10 }
  0x45   : > { %2316 = vmatpush3.msk.msra.mxu1 %vm1221_vm2, %v2534_v52 }
  0xa2   : > { %v365_v15 = vpop.permute.xlu0 %364 }
  0xa6   : > { %v2830_v9 = vpop.permute.xlu0 %369 }
  0xf1   : > { %v428_v16 = vpop.f32.mrf.mxu0 }
  0xf2   : > { %v429_v17 = vadd.f32 %v428_v16, %v365_v15  ;;  %v471_v18 = vpop.f32.mrf.mxu1 }
  0xf3   : > { %v472_v19 = vadd.f32 %v471_v18, %v365_v15  ;;  %v430_v20 = vpop.f32.mrf.mxu0 }
  0xf4   : > { %v480_v21 = vadd.f32 3.0, %v429_v17  ;;  %v431_v22 = vadd.f32 %v430_v20, %v365_v15  ;;  %v473_v23 = vpop.f32.mrf.mxu1  ;;  %v1026_v20 = vadd.s32 336, %v2716_v46 }
  0xf5   : > { %v482_v24 = vadd.f32 3.0, %v472_v19  ;;  %v474_v25 = vadd.f32 %v473_v23, %v365_v15  ;;  %v432_v6 = vpop.f32.mrf.mxu0  ;;  %v1008_v15 = vadd.s32 192, %v2716_v46  ;;  %v1041_v23 = vadd.s32 456, %v2716_v46 }
  0xf6   : > { %v488_v26 = vmax.f32 %v480_v21, 0.0  ;;  %v481_v27 = vadd.f32 3.0, %v431_v22  ;;  %v2841_v11 = vadd.f32 %v432_v6, %v2830_v9  ;;  %v475_v12 = vpop.f32.mrf.mxu1  ;;  %v1007_v21 = vadd.s32 184, %v2716_v46 }
  0xf7   : > { %v490_v28 = vmax.f32 %v482_v24, 0.0  ;;  %v483_v29 = vadd.f32 3.0, %v474_v25  ;;  %v2872_v16 = vadd.f32 %v475_v12, %v2830_v9  ;;  %vm1073_vm12 = vcmp.ge.s32.totalorder %v1008_v15, %v2719_v47  ;;  %v434_v51 = vpop.f32.mrf.mxu0 }
  0xf8   : > { %v496_v30 = vmin.f32 %v488_v26, 6.0  ;;  %v489_v31 = vmax.f32 %v481_v27, 0.0  ;;  %v484_v18 = vadd.f32 3.0, %v2841_v11  ;;  %vm1138_vm13 = vcmp.lt.s32.totalorder %v1008_v15, %v2727_v49  ;;  %v477_v57 = vpop.f32.mrf.mxu1 }
  0xf9   : > { %v498_v32 = vmin.f32 %v490_v28, 6.0  ;;  %v491_v33 = vmax.f32 %v483_v29, 0.0  ;;  %vm1202_vm5 = vmand %vm1073_vm12, %vm1138_vm13  ;;  %vm1091_vm6 = vcmp.ge.s32.totalorder %v1026_v20, %v2719_v47  ;;  %vm1156_vm7 = vcmp.lt.s32.totalorder %v1026_v20, %v2727_v49 }
  0xfa   : > { %v504_v34 = vmul.f32 0.16666667, %v496_v30  ;;  %v497_v35 = vmin.f32 %v489_v31, 6.0  ;;  %v492_v24 = vmax.f32 %v484_v18, 0.0  ;;  %v1025_v26 = vadd.s32 328, %v2716_v46  ;;  %2283 = vmatprep.subr.msk.mxu0 %vm1202_vm5, %v2534_v52  ;;  %vm1220_vm14 = vmand %vm1091_vm6, %vm1156_vm7 }
  0xfb   : > { %v506_v36 = vmul.f32 0.16666667, %v498_v32  ;;  %v499_v39 = vmin.f32 %v491_v33, 6.0  ;;  %vm1072_vm9 = vcmp.ge.s32.totalorder %v1007_v21, %v2719_v47  ;;  %vm1137_vm10 = vcmp.lt.s32.totalorder %v1007_v21, %v2727_v49 }
  0xfc   : > { %v2688_v37 = vmul.f32 %v504_v34, %v429_v17  ;;  %v505_v38 = vmul.f32 0.16666667, %v497_v35  ;;  %v1042_v17 = vadd.s32 464, %v2716_v46  ;;  %v1006_v27 = vadd.s32 176, %v2716_v46  ;;  %vm1201_vm2 = vmand %vm1072_vm9, %vm1137_vm10 }
  0xfd   : > { %v2690_v40 = vmul.f32 %v506_v36, %v472_v19  ;;  %v507_v42 = vmul.f32 0.16666667, %v499_v39  ;;  %v992_v19 = vadd.s32 64, %v2716_v46  ;;  %vm1106_vm12 = vcmp.ge.s32.totalorder %v1041_v23, %v2719_v47 }
  0xfe   : > { %520 = vrot.lane.b32.xlu1 %v2688_v37, %s2530_s14  ;;  %v2696_v41 = vmul.f32 %v505_v38, %v431_v22  ;;  %v486_v22 = vadd.f32 3.0, %v2872_v16  ;;  %vm1107_vm15 = vcmp.ge.s32.totalorder %v1042_v17, %v2719_v47  ;;  %vm1172_vm1 = vcmp.lt.s32.totalorder %v1042_v17, %v2727_v49 }
  0xff   : > { %528 = vrot.lane.b32.xlu0 %v2690_v40, %s2530_s14  ;;  %v2702_v43 = vmul.f32 %v507_v42, %v474_v25  ;;  %vm1057_vm3 = vcmp.ge.s32.totalorder %v992_v19, %v2719_v47  ;;  %vm1122_vm4 = vcmp.lt.s32.totalorder %v992_v19, %v2727_v49  ;;  %v991_v25 = vadd.s32 56, %v2716_v46  ;;  %vm1236_vm8 = vmand %vm1107_vm15, %vm1172_vm1 }
 0x100   : > { %v494_v28 = vmax.f32 %v486_v22, 0.0  ;;  %2317 = vmatprep.subr.msk.mxu1 %vm1236_vm8, %v2534_v52  ;;  %vm1186_vm11 = vmand %vm1057_vm3, %vm1122_vm4  ;;  %vm1171_vm13 = vcmp.lt.s32.totalorder %v1041_v23, %v2727_v49  ;;  %v1040_v29 = vadd.s32 448, %v2716_v46  ;;  %v500_v30 = vmin.f32 %v492_v24, 6.0 }
 0x101   : > { %2284 = vmatpush3.msk.msra.mxu0 %vm1186_vm11, %v2534_v52  ;;  %vm1056_vm15 = vcmp.ge.s32.totalorder %v991_v25, %v2719_v47  ;;  %vm1121_vm1 = vcmp.lt.s32.totalorder %v991_v25, %v2727_v49  ;;  %v990_v31 = vadd.s32 48, %v2716_v46  ;;  %2318 = vmatpush3.msk.msra.mxu1 %vm1220_vm14, %v2534_v52  ;;  %vm1090_vm3 = vcmp.ge.s32.totalorder %v1025_v26, %v2719_v47  ;;  %vm1235_vm5 = vmand %vm1106_vm12, %vm1171_vm13 }
 0x102   : > { %524 = vrot.lane.b32.xlu1 %v2696_v41, %s2530_s14  ;;  %vm1155_vm4 = vcmp.lt.s32.totalorder %v1025_v26, %v2727_v49  ;;  %v1024_v32 = vadd.s32 320, %v2716_v46  ;;  %2285 = vmatprep.subr.msk.mxu0 %vm1201_vm2, %v2534_v52  ;;  %vm1071_vm6 = vcmp.ge.s32.totalorder %v1006_v27, %v2719_v47  ;;  %vm1136_vm7 = vcmp.lt.s32.totalorder %v1006_v27, %v2727_v49  ;;  %vm1185_vm8 = vmand %vm1056_vm15, %vm1121_vm1 }
 0x103   : > { %563 = vrot.lane.b32.xlu0 %v2688_v37, %s2531_s16  ;;  %v1005_v33 = vadd.s32 168, %v2716_v46  ;;  %v502_v34 = vmin.f32 %v494_v28, 6.0  ;;  %2319 = vmatprep.subr.msk.mxu1 %vm1235_vm5, %v2534_v52  ;;  %vm1105_vm9 = vcmp.ge.s32.totalorder %v1040_v29, %v2719_v47  ;;  %vm1170_vm10 = vcmp.lt.s32.totalorder %v1040_v29, %v2727_v49  ;;  %vm1219_vm11 = vmand %vm1090_vm3, %vm1155_vm4  ;;  %v1918_v28 = vld [vmem:[%s3673_s8] sm:$0xff] }
 0x104   : > { %v1039_v35 = vadd.s32 440, %v2716_v46  ;;  %v508_v36 = vmul.f32 0.16666667, %v500_v30  ;;  %2286 = vmatpush3.msk.msra.mxu0 %vm1185_vm8, %v2534_v52  ;;  %vm1055_vm12 = vcmp.ge.s32.totalorder %v990_v31, %v2719_v47  ;;  %vm1120_vm13 = vcmp.lt.s32.totalorder %v990_v31, %v2727_v49  ;;  %2320 = vmatpush3.msk.msra.mxu1 %vm1219_vm11, %v2534_v52  ;;  %vm1200_vm14 = vmand %vm1071_vm6, %vm1136_vm7 }
 0x105   : > { %v989_v38 = vadd.s32 40, %v2716_v46  ;;  %vm1089_vm15 = vcmp.ge.s32.totalorder %v1024_v32, %v2719_v47  ;;  %vm1154_vm1 = vcmp.lt.s32.totalorder %v1024_v32, %v2727_v49  ;;  %v1023_v39 = vadd.s32 312, %v2716_v46  ;;  %2287 = vmatprep.subr.msk.mxu0 %vm1200_vm14, %v2534_v52  ;;  %vm1234_vm2 = vmand %vm1105_vm9, %vm1170_vm10  ;;  %v939_v32 = vld [vmem:[%s3669_s4 + $0x8] sm:$0xff] }
 0x106   : > { %532 = vrot.lane.b32.xlu1 %v2702_v43, %s2530_s14  ;;  %vm1070_vm3 = vcmp.ge.s32.totalorder %v1005_v33, %v2719_v47  ;;  %vm1135_vm4 = vcmp.lt.s32.totalorder %v1005_v33, %v2727_v49  ;;  %v1004_v42 = vadd.s32 160, %v2716_v46  ;;  %v510_v44 = vmul.f32 0.16666667, %v502_v34  ;;  %2321 = vmatprep.subr.msk.mxu1 %vm1234_vm2, %v2534_v52  ;;  %vm1184_vm5 = vmand %vm1055_vm12, %vm1120_vm13 }
 0x107   : > { %571 = vrot.lane.b32.xlu0 %v2690_v40, %s2531_s16  ;;  %vm1104_vm6 = vcmp.ge.s32.totalorder %v1039_v35, %v2719_v47  ;;  %vm1169_vm7 = vcmp.lt.s32.totalorder %v1039_v35, %v2727_v49  ;;  %v3029_v50 = vmul.f32 %v508_v36, %v2841_v11  ;;  %2288 = vmatpush3.msk.msra.mxu0 %vm1184_vm5, %v2534_v52  ;;  %vm1218_vm8 = vmand %vm1089_vm15, %vm1154_vm1  ;;  %v1001_v6 = vadd.s32 136, %v2716_v46 }
 0x108   : > { %vm1054_vm9 = vcmp.ge.s32.totalorder %v989_v38, %v2719_v47  ;;  %vm1119_vm10 = vcmp.lt.s32.totalorder %v989_v38, %v2727_v49  ;;  %2322 = vmatpush3.msk.msra.mxu1 %vm1218_vm8, %v2534_v52  ;;  %vm1199_vm11 = vmand %vm1070_vm3, %vm1135_vm4  ;;  %vm1088_vm12 = vcmp.ge.s32.totalorder %v1023_v39, %v2719_v47  ;;  %vm1153_vm13 = vcmp.lt.s32.totalorder %v1023_v39, %v2727_v49 }
 0x109   : > { %2289 = vmatprep.subr.msk.mxu0 %vm1199_vm11, %v2534_v52  ;;  %vm1233_vm14 = vmand %vm1104_vm6, %vm1169_vm7  ;;  %vm1069_vm15 = vcmp.ge.s32.totalorder %v1004_v42, %v2719_v47  ;;  %vm1134_vm1 = vcmp.lt.s32.totalorder %v1004_v42, %v2727_v49  ;;  %v3060_v56 = vadd.f32 %v434_v51, %v2830_v9  ;;  %vm1103_vm3 = vcmp.ge.s32.totalorder %v1038_v48, %v2719_v47 }
 0x10a   : > { %567 = vrot.lane.b32.xlu1 %v2696_v41, %s2531_s16  ;;  %2323 = vmatprep.subr.msk.mxu1 %vm1233_vm14, %v2534_v52  ;;  %vm1183_vm2 = vmand %vm1054_vm9, %vm1119_vm10  ;;  %vm1168_vm4 = vcmp.lt.s32.totalorder %v1038_v48, %v2727_v49  ;;  %v3071_v59 = vmul.f32 %v510_v44, %v2872_v16  ;;  %vm1053_vm6 = vcmp.ge.s32.totalorder %v988_v53, %v2719_v47  ;;  %v1000_v12 = vadd.s32 128, %v2716_v46 }
 0x10b   : > { %613 = vrot.lane.b32.xlu0 %v2688_v37, %s2532_s17  ;;  %2290 = vmatpush3.msk.msra.mxu0 %vm1183_vm2, %v2534_v52  ;;  %vm1217_vm5 = vmand %vm1088_vm12, %vm1153_vm13  ;;  %vm1118_vm7 = vcmp.lt.s32.totalorder %v988_v53, %v2727_v49  ;;  %vm1087_vm9 = vcmp.ge.s32.totalorder %v1022_v54, %v2719_v47  ;;  %vm1152_vm10 = vcmp.lt.s32.totalorder %v1022_v54, %v2727_v49  ;;  %v485_v1 = vadd.f32 3.0, %v3060_v56  ;;  %v589_v54 = vld [vmem:[#allocation2 + $0x40] sm:$0xff] }
 0x10c   : > { %2324 = vmatpush3.msk.msra.mxu1 %vm1217_vm5, %v2534_v52  ;;  %vm1198_vm8 = vmand %vm1069_vm15, %vm1134_vm1  ;;  %v3092_v62 = vadd.f32 %v477_v57, %v2830_v9  ;;  %vm1068_vm12 = vcmp.ge.s32.totalorder %v1003_v55, %v2719_v47  ;;  %vm1133_vm13 = vcmp.lt.s32.totalorder %v1003_v55, %v2727_v49  ;;  %vm1102_vm15 = vcmp.ge.s32.totalorder %v1037_v58, %v2719_v47  ;;  %v548_v57 = vld [vmem:[#allocation2 + $0x8] sm:$0xff] }
 0x10d   : > { %2291 = vmatprep.subr.msk.mxu0 %vm1198_vm8, %v2534_v52  ;;  %vm1232_vm11 = vmand %vm1103_vm3, %vm1168_vm4  ;;  %vm1167_vm1 = vcmp.lt.s32.totalorder %v1037_v58, %v2727_v49  ;;  %vm1052_vm3 = vcmp.ge.s32.totalorder %v987_v60, %v2719_v47  ;;  %vm1117_vm4 = vcmp.lt.s32.totalorder %v987_v60, %v2727_v49  ;;  %v493_v7 = vmax.f32 %v485_v1, 0.0  ;;  %v547_v60 = vld [vmem:[#allocation2] sm:$0xff] }
 0x10e   : > { %575 = vrot.lane.b32.xlu1 %v2702_v43, %s2531_s16  ;;  %2325 = vmatprep.subr.msk.mxu1 %vm1232_vm11, %v2534_v52  ;;  %vm1182_vm14 = vmand %vm1053_vm6, %vm1118_vm7  ;;  %vm1086_vm6 = vcmp.ge.s32.totalorder %v1021_v61, %v2719_v47  ;;  %vm1151_vm7 = vcmp.lt.s32.totalorder %v1021_v61, %v2727_v49  ;;  %v487_v5 = vadd.f32 3.0, %v3092_v62  ;;  %v985_v9 = vadd.s32 8, %v2716_v46  ;;  %v639_v1 = vld [vmem:[#allocation2 + $0x80] sm:$0xff] }
 0x10f   : > { %621 = vrot.lane.b32.xlu0 %v2690_v40, %s2532_s17  ;;  %2292 = vmatpush3.msk.msra.mxu0 %vm1182_vm14, %v2534_v52  ;;  %vm1216_vm2 = vmand %vm1087_vm9, %vm1152_vm10  ;;  %vm1067_vm9 = vcmp.ge.s32.totalorder %v1002_v63, %v2719_v47  ;;  %vm1132_vm10 = vcmp.lt.s32.totalorder %v1002_v63, %v2727_v49  ;;  %v501_v13 = vmin.f32 %v493_v7, 6.0  ;;  %v1018_v15 = vadd.s32 272, %v2716_v46 }
 0x110   : > { %2326 = vmatpush3.msk.msra.mxu1 %vm1216_vm2, %v2534_v52  ;;  %vm1197_vm5 = vmand %vm1068_vm12, %vm1133_vm13  ;;  %vm1101_vm12 = vcmp.ge.s32.totalorder %v1036_v2, %v2719_v47  ;;  %vm1166_vm13 = vcmp.lt.s32.totalorder %v1036_v2, %v2727_v49  ;;  %v495_v11 = vmax.f32 %v487_v5, 0.0  ;;  %v1033_v17 = vadd.s32 392, %v2716_v46 }
 0x111   : > { %2293 = vmatprep.subr.msk.mxu0 %vm1197_vm5, %v2534_v52  ;;  %vm1231_vm8 = vmand %vm1102_vm15, %vm1167_vm1  ;;  %vm1051_vm15 = vcmp.ge.s32.totalorder %v986_v3, %v2719_v47  ;;  %vm1116_vm1 = vcmp.lt.s32.totalorder %v986_v3, %v2727_v49  ;;  %v509_v18 = vmul.f32 0.16666667, %v501_v13  ;;  %v1017_v19 = vadd.s32 264, %v2716_v46 }
 0x112   : > { %617 = vrot.lane.b32.xlu1 %v2696_v41, %s2532_s17  ;;  %2327 = vmatprep.subr.msk.mxu1 %vm1231_vm8, %v2534_v52  ;;  %vm1181_vm11 = vmand %vm1052_vm3, %vm1117_vm4  ;;  %vm1085_vm3 = vcmp.ge.s32.totalorder %v1020_v4, %v2719_v47  ;;  %vm1150_vm4 = vcmp.lt.s32.totalorder %v1020_v4, %v2727_v49  ;;  %v503_v16 = vmin.f32 %v495_v11, 6.0  ;;  %v1032_v20 = vadd.s32 384, %v2716_v46  ;;  %v591_v4 = vld [vmem:[#allocation2 + $0x50] sm:$0xff] }
 0x113   : > { %663 = vrot.lane.b32.xlu0 %v2688_v37, %s2533_s22  ;;  %2294 = vmatpush3.msk.msra.mxu0 %vm1181_vm11, %v2534_v52  ;;  %vm1215_vm14 = vmand %vm1086_vm6, %vm1151_vm7  ;;  %vm1066_vm6 = vcmp.ge.s32.totalorder %v1001_v6, %v2719_v47  ;;  %vm1131_vm7 = vcmp.lt.s32.totalorder %v1001_v6, %v2727_v49  ;;  %v1016_v21 = vadd.s32 256, %v2716_v46  ;;  %v3249_v22 = vmul.f32 %v509_v18, %v3060_v56  ;;  %v592_v6 = vld [vmem:[#allocation2 + $0x58] sm:$0xff] }
 0x114   : > { %2328 = vmatpush3.msk.msra.mxu1 %vm1215_vm14, %v2534_v52  ;;  %vm1196_vm2 = vmand %vm1067_vm9, %vm1132_vm10  ;;  %vm1100_vm9 = vcmp.ge.s32.totalorder %v1035_v8, %v2719_v47  ;;  %vm1165_vm10 = vcmp.lt.s32.totalorder %v1035_v8, %v2727_v49  ;;  %v511_v23 = vmul.f32 0.16666667, %v503_v16  ;;  %v550_v18 = vld [vmem:[#allocation2 + $0x18] sm:$0xff] }
 0x115   : > { %2295 = vmatprep.subr.msk.mxu0 %vm1196_vm2, %v2534_v52  ;;  %vm1230_vm5 = vmand %vm1101_vm12, %vm1166_vm13  ;;  %vm1050_vm12 = vcmp.ge.s32.totalorder %v985_v9, %v2719_v47  ;;  %vm1115_vm13 = vcmp.lt.s32.totalorder %v985_v9, %v2727_v49 }
 0x116   : > { %625 = vrot.lane.b32.xlu1 %v2702_v43, %s2532_s17  ;;  %2329 = vmatprep.subr.msk.mxu1 %vm1230_vm5, %v2534_v52  ;;  %vm1180_vm8 = vmand %vm1051_vm15, %vm1116_vm1  ;;  %vm1084_vm15 = vcmp.ge.s32.totalorder %v1019_v10, %v2719_v47  ;;  %vm1149_vm1 = vcmp.lt.s32.totalorder %v1019_v10, %v2727_v49  ;;  %v3274_v24 = vmul.f32 %v511_v23, %v3092_v62  ;;  %v590_v62 = vld [vmem:[#allocation2 + $0x48] sm:$0xff] }
 0x117   : > { %671 = vrot.lane.b32.xlu0 %v2690_v40, %s2533_s22  ;;  %2296 = vmatpush3.msk.msra.mxu0 %vm1180_vm8, %v2534_v52  ;;  %vm1214_vm11 = vmand %vm1085_vm3, %vm1150_vm4  ;;  %vm1065_vm3 = vcmp.ge.s32.totalorder %v1000_v12, %v2719_v47  ;;  %vm1130_vm4 = vcmp.lt.s32.totalorder %v1000_v12, %v2727_v49  ;;  %v640_v12 = vld [vmem:[#allocation2 + $0x88] sm:$0xff] }
 0x118   : > { %2330 = vmatpush3.msk.msra.mxu1 %vm1214_vm11, %v2534_v52  ;;  %vm1195_vm14 = vmand %vm1066_vm6, %vm1131_vm7  ;;  %vm1099_vm6 = vcmp.ge.s32.totalorder %v1034_v14, %v2719_v47  ;;  %vm1164_vm7 = vcmp.lt.s32.totalorder %v1034_v14, %v2727_v49  ;;  %v689_v14 = vld [vmem:[#allocation2 + $0xc0] sm:$0xff] }
 0x119   : > { %2297 = vmatprep.subr.msk.mxu0 %vm1195_vm14, %v2534_v52  ;;  %vm1229_vm2 = vmand %vm1100_vm9, %vm1165_vm10  ;;  %vm1049_vm9 = vcmp.ge.s32.totalorder %v2716_v46, %v2719_v47  ;;  %vm1114_vm10 = vcmp.lt.s32.totalorder %v2716_v46, %v2727_v49 }
 0x11a   : > { %667 = vrot.lane.b32.xlu1 %v2696_v41, %s2533_s22  ;;  %2331 = vmatprep.subr.msk.mxu1 %vm1229_vm2, %v2534_v52  ;;  %vm1179_vm5 = vmand %vm1050_vm12, %vm1115_vm13  ;;  %vm1083_vm12 = vcmp.ge.s32.totalorder %v1018_v15, %v2719_v47  ;;  %vm1148_vm13 = vcmp.lt.s32.totalorder %v1018_v15, %v2727_v49 }
 0x11b   : > { %738 = vrot.lane.b32.xlu0 %v2688_v37, %s2535_s23  ;;  %2298 = vmatpush3.msk.msra.mxu0 %vm1179_vm5, %v2534_v52  ;;  %vm1213_vm8 = vmand %vm1084_vm15, %vm1149_vm1  ;;  %vm1098_vm15 = vcmp.ge.s32.totalorder %v1033_v17, %v2719_v47  ;;  %vm1163_vm1 = vcmp.lt.s32.totalorder %v1033_v17, %v2727_v49  ;;  %v549_v17 = vld [vmem:[#allocation2 + $0x10] sm:$0xff] }
 0x11c   : > { %2332 = vmatpush3.msk.msra.mxu1 %vm1213_vm8, %v2534_v52  ;;  %vm1194_vm11 = vmand %vm1065_vm3, %vm1130_vm4  ;;  %vm1082_vm3 = vcmp.ge.s32.totalorder %v1017_v19, %v2719_v47  ;;  %vm1147_vm4 = vcmp.lt.s32.totalorder %v1017_v19, %v2727_v49 }
 0x11d   : > { %2299 = vmatprep.subr.msk.mxu0 %vm1194_vm11, %v2534_v52  ;;  %vm1228_vm14 = vmand %vm1099_vm6, %vm1164_vm7  ;;  %vm1097_vm6 = vcmp.ge.s32.totalorder %v1032_v20, %v2719_v47  ;;  %vm1162_vm7 = vcmp.lt.s32.totalorder %v1032_v20, %v2727_v49 }
 0x11e   : > { %675 = vrot.lane.b32.xlu1 %v2702_v43, %s2533_s22  ;;  %2333 = vmatprep.subr.msk.mxu1 %vm1228_vm14, %v2534_v52  ;;  %vm1178_vm2 = vmand %vm1049_vm9, %vm1114_vm10  ;;  %vm1081_vm9 = vcmp.ge.s32.totalorder %v1016_v21, %v2719_v47  ;;  %vm1146_vm10 = vcmp.lt.s32.totalorder %v1016_v21, %v2727_v49  ;;  %v3303_v47 = vpop.permute.xlu0 %942  ;;  %vm538_vm14 = vcmp.lt.s32.totalorder %v2712_v45, 17  ;;  %v641_v21 = vld [vmem:[#allocation2 + $0x90] sm:$0xff] }
 0x11f   : > { %746 = vrot.lane.b32.xlu0 %v2690_v40, %s2535_s23  ;;  %2300 = vmatpush3.msk.msra.mxu0 %vm1178_vm2, %v2534_v52  ;;  %vm1212_vm5 = vmand %vm1083_vm12, %vm1148_vm13  ;;  %vm679_vm2 = vcmp.lt.s32.totalorder %v2712_v45, 1 }
 0x120   : > { %2334 = vmatpush3.msk.msra.mxu1 %vm1212_vm5, %v2534_v52  ;;  %vm1227_vm8 = vmand %vm1098_vm15, %vm1163_vm1  ;;  %vm579_vm15 = vcmp.lt.s32.totalorder %v2712_v45, 16  ;;  %vm629_vm1 = vcmp.lt.s32.totalorder %v2712_v45, 15  ;;  %vm854_vm5 = vcmp.lt.s32.totalorder %v2712_v45, 112 }
 0x121   : > { %2335 = vmatprep.subr.msk.mxu1 %vm1227_vm8, %v2534_v52  ;;  %vm1211_vm11 = vmand %vm1082_vm3, %vm1147_vm4  ;;  %vm754_vm3 = vcmp.lt.s32.totalorder %v2712_v45, 127  ;;  %vm804_vm4 = vcmp.lt.s32.totalorder %v2712_v45, 113  ;;  %vm1523_vm8 = vcmask 130048  }
 0x122   : > { %742 = vrot.lane.b32.xlu1 %v2696_v41, %s2535_s23  ;;  %2336 = vmatpush3.msk.msra.mxu1 %vm1211_vm11, %v2534_v52  ;;  %vm1226_vm12 = vmand %vm1097_vm6, %vm1162_vm7  ;;  %vm904_vm6 = vcmp.lt.s32.totalorder %v2712_v45, 111  ;;  %vm2540_vm7 = vmmov 0  }
 0x123   : > { %788 = vrot.lane.b32.xlu0 %v2688_v37, %s2536_s24  ;;  %2337 = vmatprep.subr.msk.mxu1 %vm1226_vm12, %v2534_v52  ;;  %vm1210_vm13 = vmand %vm1081_vm9, %vm1146_vm10  ;;  %vm1600_vm9 = vcmask 31744  }
 0x124   : > { %2338 = vmatpush3.msk.msra.mxu1 %vm1210_vm13, %v2534_v52 }
 0x126   : > { %750 = vrot.lane.b32.xlu1 %v2702_v43, %s2535_s23 }
 0x127   : > { %796 = vrot.lane.b32.xlu0 %v2690_v40, %s2536_s24 }
 0x12a   : > { %792 = vrot.lane.b32.xlu1 %v2696_v41, %s2536_s24 }
 0x12b   : > { %838 = vrot.lane.b32.xlu0 %v2688_v37, %s2537_s25 }
 0x12e   : > { %800 = vrot.lane.b32.xlu1 %v2702_v43, %s2536_s24 }
 0x12f   : > { %846 = vrot.lane.b32.xlu0 %v2690_v40, %s2537_s25 }
 0x132   : > { %842 = vrot.lane.b32.xlu1 %v2696_v41, %s2537_s25 }
 0x133   : > { %888 = vrot.lane.b32.xlu0 %v2688_v37, %s2538_s26 }
 0x136   : > { %850 = vrot.lane.b32.xlu1 %v2702_v43, %s2537_s25 }
 0x137   : > { %896 = vrot.lane.b32.xlu0 %v2690_v40, %s2538_s26 }
 0x13a   : > { %892 = vrot.lane.b32.xlu1 %v2696_v41, %s2538_s26 }
 0x13b   : > { %522 = vrot.lane.b32.xlu0 %v3029_v50, %s2530_s14 }
 0x13e   : > { %900 = vrot.lane.b32.xlu1 %v2702_v43, %s2538_s26 }
 0x13f   : > { %530 = vrot.lane.b32.xlu0 %v3071_v59, %s2530_s14 }
 0x142   : > { %840 = vrot.lane.b32.xlu1 %v3029_v50, %s2537_s25 }
 0x143   : > { %565 = vrot.lane.b32.xlu0 %v3029_v50, %s2531_s16 }
 0x146   : > { %848 = vrot.lane.b32.xlu1 %v3071_v59, %s2537_s25 }
 0x147   : > { %573 = vrot.lane.b32.xlu0 %v3071_v59, %s2531_s16 }
 0x14a   : > { %890 = vrot.lane.b32.xlu1 %v3029_v50, %s2538_s26 }
 0x14b   : > { %615 = vrot.lane.b32.xlu0 %v3029_v50, %s2532_s17 }
 0x14e   : > { %898 = vrot.lane.b32.xlu1 %v3071_v59, %s2538_s26 }
 0x14f   : > { %623 = vrot.lane.b32.xlu0 %v3071_v59, %s2532_s17 }
 0x152   : > { %526 = vrot.lane.b32.xlu1 %v3249_v22, %s2530_s14 }
 0x153   : > { %665 = vrot.lane.b32.xlu0 %v3029_v50, %s2533_s22 }
 0x156   : > { %534 = vrot.lane.b32.xlu1 %v3274_v24, %s2530_s14  ;;  %s2268_s14 = sshll.u32 %s2613_s13, 9 }
 0x157   : > { %673 = vrot.lane.b32.xlu0 %v3071_v59, %s2533_s22 }
 0x15a   : > { %569 = vrot.lane.b32.xlu1 %v3249_v22, %s2531_s16 }
 0x15b   : > { %740 = vrot.lane.b32.xlu0 %v3029_v50, %s2535_s23 }
 0x15e   : > { %577 = vrot.lane.b32.xlu1 %v3274_v24, %s2531_s16  ;;  %s341_s16 = scalar_lea.vmem [#allocation5], %s2109_s29 }
 0x15f   : > { %748 = vrot.lane.b32.xlu0 %v3071_v59, %s2535_s23 }
 0x162   : > { %619 = vrot.lane.b32.xlu1 %v3249_v22, %s2532_s17 }
 0x163   : > { %790 = vrot.lane.b32.xlu0 %v3029_v50, %s2536_s24 }
 0x166   : > { %627 = vrot.lane.b32.xlu1 %v3274_v24, %s2532_s17  ;;  %s2032_s17 = sshll.u32 %s341_s16, 4  ;;  %s3624_s17 = int_to_ptr.vmem [resolvable:$true] %s2032_s17 }
 0x167   : > { %798 = vrot.lane.b32.xlu0 %v3071_v59, %s2536_s24 }
 0x16a   : > { %669 = vrot.lane.b32.xlu1 %v3249_v22, %s2533_s22 }
 0x16b   : > { %844 = vrot.lane.b32.xlu0 %v3249_v22, %s2537_s25 }
 0x16e   : > { %677 = vrot.lane.b32.xlu1 %v3274_v24, %s2533_s22 }
 0x16f   : > { %852 = vrot.lane.b32.xlu0 %v3274_v24, %s2537_s25  ;;  %s2460_s25 = scalar_lea.vmem %s3624_s17, 512 }
 0x170   : > { %v521_v49 = vpop.permute.xlu1 %520  ;;  %p2461_p6 = scmp.ne.s32.totalorder %s3624_s17, %s2460_s25 }
 0x171   : > { %v529_v52 = vpop.permute.xlu0 %528 }
 0x172   : > { %744 = vrot.lane.b32.xlu1 %v3249_v22, %s2535_s23  ;;  %p2462_p9 = pnand %p2461_p6, %p2630_p5 }
 0x173   : > { %894 = vrot.lane.b32.xlu0 %v3249_v22, %s2538_s26 }
 0x174   : > { %v525_v25 = vpop.permute.xlu1 %524  ;;  %p2463_p10 = pneg %p2462_p9 }
 0x175   : > { %v564_v26 = vpop.permute.xlu0 %563  ;;  %v543_v58 = vsel %vm538_vm14, %v521_v49, %v525_v25  ;;  %v541_v3 = vsel %vm538_vm14, %v525_v25, %v529_v52 }
 0x176   : > { %752 = vrot.lane.b32.xlu1 %v3274_v24, %s2535_s23  ;;  %v556_v10 = vmul.f32 %v548_v57, %v543_v58  ;;  %s3622_s23 = scalar_lea.hbm %s3674_s9, %s2268_s14 }
 0x177   : > { %902 = vrot.lane.b32.xlu0 %v3274_v24, %s2538_s26 }
 0x178   : > { %v533_v27 = vpop.permute.xlu1 %532 }
 0x179   : > { %v572_v29 = vpop.permute.xlu0 %571  ;;  %v545_v61 = vsel %vm538_vm14, %v533_v27, %v521_v49  ;;  %v539_v11 = vsel %vm538_vm14, %v529_v52, %v533_v27 }
 0x17a   : > { %794 = vrot.lane.b32.xlu1 %v3249_v22, %s2536_s24  ;;  %v555_v19 = vmul.f32 %v547_v60, %v545_v61  ;;  %v558_v57 = vmul.f32 %v550_v18, %v539_v11  ;;  %v692_v60 = vld [vmem:[#allocation2 + $0xd8] sm:$0xff] }
 0x17b   : > { %1921 = vperm.xlu0 %2427, %v1918_v28   ;;  %v690_v28 = vld [vmem:[#allocation2 + $0xc8] sm:$0xff] }
 0x17c   : > { %v568_v30 = vpop.permute.xlu1 %567 }
 0x17d   : > { %v614_v31 = vpop.permute.xlu0 %613  ;;  %v584_v63 = vsel %vm579_vm15, %v564_v26, %v568_v30  ;;  %v582_v5 = vsel %vm579_vm15, %v568_v30, %v572_v29 }
 0x17e   : > { %802 = vrot.lane.b32.xlu1 %v3274_v24, %s2536_s24  ;;  %v598_v20 = vmul.f32 %v590_v62, %v584_v63  ;;  %v599_v52 = vmul.f32 %v591_v4, %v582_v5  ;;  %s2018_s24 = scalar_lea.sflag [#allocation4], %s339_s28 }
 0x180   : > { %v576_v33 = vpop.permute.xlu1 %575 }
 0x181   : > { %v622_v34 = vpop.permute.xlu0 %621  ;;  %v586_v55 = vsel %vm579_vm15, %v576_v33, %v564_v26  ;;  %v580_v7 = vsel %vm579_vm15, %v572_v29, %v576_v33  ;;  %v642_v26 = vld [vmem:[#allocation2 + $0x98] sm:$0xff] }
 0x182   : > { %947 = vperm.xlu1 %2428, %v939_v32   ;;  %v597_v8 = vmul.f32 %v589_v54, %v586_v55  ;;  %v600_v25 = vmul.f32 %v592_v6, %v580_v7  ;;  %v691_v32 = vld [vmem:[#allocation2 + $0xd0] sm:$0xff]  ;;  %v715_v7 = vld [vmem:[#allocation2 + $0x108] sm:$0xff] }
 0x184   : > { %v618_v35 = vpop.permute.xlu1 %617  ;;  %v605_v30 = vadd.f32 %v597_v8, %v555_v19  ;;  %v716_v19 = vld [vmem:[#allocation2 + $0x110] sm:$0xff] }
 0x185   : > { %v664_v36 = vpop.permute.xlu0 %663  ;;  %v634_v13 = vsel %vm629_vm1, %v614_v31, %v618_v35  ;;  %v632_v23 = vsel %vm629_vm1, %v618_v35, %v622_v34  ;;  %v557_v35 = vmul.f32 %v549_v17, %v541_v3 }
 0x186   : > { %v649_v58 = vmul.f32 %v641_v21, %v632_v23 }
 0x188   : > { %v626_v38 = vpop.permute.xlu1 %625 }
 0x189   : > { %v672_v39 = vpop.permute.xlu0 %671  ;;  %v636_v2 = vsel %vm629_vm1, %v626_v38, %v614_v31  ;;  %v630_v27 = vsel %vm629_vm1, %v622_v34, %v626_v38  ;;  %v648_v31 = vmul.f32 %v640_v12, %v634_v13  ;;  %v606_v38 = vadd.f32 %v598_v20, %v556_v10  ;;  %v764_v13 = vld [vmem:[#allocation2 + $0x140] sm:$0xff]  ;;  %v717_v20 = vld [vmem:[#allocation2 + $0x118] sm:$0xff] }
 0x18a   : > { %v647_v49 = vmul.f32 %v639_v1, %v636_v2  ;;  %v650_v62 = vmul.f32 %v642_v26, %v630_v27  ;;  %v714_v1 = vld [vmem:[#allocation2 + $0x100] sm:$0xff]  ;;  %v607_v2 = vadd.f32 %v599_v52, %v557_v35  ;;  %v767_v52 = vld [vmem:[#allocation2 + $0x158] sm:$0xff] }
 0x18b   : > { %v656_v5 = vadd.f32 %v648_v31, %v606_v38  ;;  %v864_v35 = vld [vmem:[#allocation2 + $0x1c0] sm:$0xff]  ;;  %v816_v38 = vld [vmem:[#allocation2 + $0x190] sm:$0xff] }
 0x18c   : > { %v668_v42 = vpop.permute.xlu1 %667  ;;  %v657_v11 = vadd.f32 %v649_v58, %v607_v2 }
 0x18d   : > { %v3327_v44 = vpop.permute.xlu0 %738  ;;  %v684_v29 = vsel %vm679_vm2, %v664_v36, %v668_v42  ;;  %v682_v33 = vsel %vm679_vm2, %v668_v42, %v672_v39  ;;  %v608_v42 = vadd.f32 %v600_v25, %v558_v57  ;;  %v865_v57 = vld [vmem:[#allocation2 + $0x1c8] sm:$0xff] }
 0x18e   : > { %v698_v63 = vmul.f32 %v690_v28, %v684_v29  ;;  %v699_v4 = vmul.f32 %v691_v32, %v682_v33  ;;  %v814_v28 = vld [vmem:[#allocation2 + $0x180] sm:$0xff]  ;;  %v815_v29 = vld [vmem:[#allocation2 + $0x188] sm:$0xff]  ;;  %v724_v33 = vmul.f32 %v716_v19, %v2690_v40 }
 0x18f   : > { %v658_v10 = vadd.f32 %v650_v62, %v608_v42  ;;  %v817_v62 = vld [vmem:[#allocation2 + $0x198] sm:$0xff] }
 0x190   : > { %v676_v48 = vpop.permute.xlu1 %675  ;;  %v706_v12 = vadd.f32 %v698_v63, %v656_v5  ;;  %v707_v18 = vadd.f32 %v699_v4, %v657_v11 }
 0x191   : > { %v3329_v51 = vpop.permute.xlu0 %746  ;;  %v686_v15 = vsel %vm679_vm2, %v676_v48, %v664_v36  ;;  %v680_v61 = vsel %vm679_vm2, %v672_v39, %v676_v48  ;;  %v655_v36 = vadd.f32 %v647_v49, %v605_v30  ;;  %v722_v39 = vmul.f32 %v714_v1, %v2688_v37  ;;  %v766_v49 = vld [vmem:[#allocation2 + $0x150] sm:$0xff] }
 0x192   : > { %v697_v54 = vmul.f32 %v689_v14, %v686_v15  ;;  %v700_v3 = vmul.f32 %v692_v60, %v680_v61  ;;  %v765_v14 = vld [vmem:[#allocation2 + $0x148] sm:$0xff]  ;;  %v723_v37 = vmul.f32 %v715_v7, %v2696_v41  ;;  %v732_v2 = vadd.f32 %v724_v33, %v707_v18  ;;  %v867_v7 = vld [vmem:[#allocation2 + $0x1d8] sm:$0xff] }
 0x194   : > { %v3333_v53 = vpop.permute.xlu1 %742  ;;  %v705_v6 = vadd.f32 %v697_v54, %v655_v36  ;;  %v708_v21 = vadd.f32 %v700_v3, %v658_v10  ;;  %v725_v54 = vmul.f32 %v717_v20, %v2702_v43 }
 0x195   : > { %v3337_v56 = vpop.permute.xlu0 %788  ;;  %v757_v15 = vsel %vm754_vm3, %v3333_v53, %v3329_v51  ;;  %v759_v17 = vsel %vm754_vm3, %v3327_v44, %v3333_v53 }
 0x196   : > { %v730_v23 = vadd.f32 %v722_v39, %v705_v6  ;;  %v772_v41 = vmul.f32 %v764_v13, %v759_v17  ;;  %v773_v27 = vmul.f32 %v765_v14, %v757_v15  ;;  %v733_v4 = vadd.f32 %v725_v54, %v708_v21  ;;  %v866_v6 = vld [vmem:[#allocation2 + $0x1d0] sm:$0xff] }
 0x198   : > { %v3355_v9 = vpop.permute.xlu1 %750  ;;  %v780_v63 = vadd.f32 %v772_v41, %v730_v23 }
 0x199   : > { %v3363_v16 = vpop.permute.xlu0 %796  ;;  %v755_v25 = vsel %vm754_vm3, %v3329_v51, %v3355_v9  ;;  %v761_v53 = vsel %vm754_vm3, %v3355_v9, %v3327_v44  ;;  %v731_v51 = vadd.f32 %v723_v37, %v706_v12 }
 0x19a   : > { %v774_v44 = vmul.f32 %v766_v49, %v755_v25  ;;  %v775_v9 = vmul.f32 %v767_v52, %v761_v53  ;;  %v916_v53 = vld [vmem:[#allocation2 + $0x210] sm:$0xff] }
 0x19b   : > { %v781_v1 = vadd.f32 %v773_v27, %v731_v51 }
 0x19c   : > { %v793_v55 = vpop.permute.xlu1 %792  ;;  %v782_v12 = vadd.f32 %v774_v44, %v732_v2  ;;  %v783_v13 = vadd.f32 %v775_v9, %v733_v4 }
 0x19d   : > { %v3375_v34 = vpop.permute.xlu0 %838  ;;  %v807_v30 = vsel %vm804_vm4, %v793_v55, %v3363_v16  ;;  %v809_v31 = vsel %vm804_vm4, %v3337_v56, %v793_v55 }
 0x19e   : > { %v822_v55 = vmul.f32 %v814_v28, %v809_v31  ;;  %v823_v61 = vmul.f32 %v815_v29, %v807_v30 }
 0x1a0   : > { %v801_v8 = vpop.permute.xlu1 %800  ;;  %v830_v14 = vadd.f32 %v822_v55, %v780_v63  ;;  %v831_v15 = vadd.f32 %v823_v61, %v781_v1 }
 0x1a1   : > { %v847_v48 = vpop.permute.xlu0 %846  ;;  %v805_v40 = vsel %vm804_vm4, %v3363_v16, %v801_v8  ;;  %v811_v43 = vsel %vm804_vm4, %v801_v8, %v3337_v56  ;;  %v914_v56 = vld [vmem:[#allocation2 + $0x200] sm:$0xff]  ;;  %v915_v8 = vld [vmem:[#allocation2 + $0x208] sm:$0xff] }
 0x1a2   : > { %v824_v39 = vmul.f32 %v816_v38, %v805_v40  ;;  %v825_v10 = vmul.f32 %v817_v62, %v811_v43 }
 0x1a4   : > { %v843_v26 = vpop.permute.xlu1 %842  ;;  %v832_v52 = vadd.f32 %v824_v39, %v782_v12  ;;  %v833_v25 = vadd.f32 %v825_v10, %v783_v13  ;;  %v593_v10 = vld [vmem:[#allocation2 + $0x60] sm:$0xff] }
 0x1a5   : > { %v889_v32 = vpop.permute.xlu0 %888  ;;  %v857_v58 = vsel %vm854_vm5, %v843_v26, %v847_v48  ;;  %v859_v60 = vsel %vm854_vm5, %v3375_v34, %v843_v26  ;;  %v917_v26 = vld [vmem:[#allocation2 + $0x218] sm:$0xff]  ;;  %v643_v13 = vld [vmem:[#allocation2 + $0xa0] sm:$0xff] }
 0x1a6   : > { %v872_v5 = vmul.f32 %v864_v35, %v859_v60  ;;  %v873_v3 = vmul.f32 %v865_v57, %v857_v58 }
 0x1a8   : > { %v851_v36 = vpop.permute.xlu1 %850  ;;  %v880_v21 = vadd.f32 %v872_v5, %v830_v14 }
 0x1a9   : > { %v897_v42 = vpop.permute.xlu0 %896  ;;  %v855_v11 = vsel %vm854_vm5, %v847_v48, %v851_v36  ;;  %v861_v16 = vsel %vm854_vm5, %v851_v36, %v3375_v34  ;;  %v881_v34 = vadd.f32 %v873_v3, %v831_v15 }
 0x1aa   : > { %v874_v18 = vmul.f32 %v866_v6, %v855_v11  ;;  %v875_v37 = vmul.f32 %v867_v7, %v861_v16 }
 0x1ac   : > { %v893_v17 = vpop.permute.xlu1 %892  ;;  %v882_v29 = vadd.f32 %v874_v18, %v832_v52  ;;  %v883_v30 = vadd.f32 %v875_v37, %v833_v25  ;;  %v594_v37 = vld [vmem:[#allocation2 + $0x68] sm:$0xff] }
 0x1ad   : > { %v523_v19 = vpop.permute.xlu0 %522  ;;  %v907_v20 = vsel %vm904_vm6, %v893_v17, %v897_v42  ;;  %v909_v48 = vsel %vm904_vm6, %v889_v32, %v893_v17  ;;  %v552_v17 = vld [vmem:[#allocation2 + $0x28] sm:$0xff] }
 0x1ae   : > { %v922_v23 = vmul.f32 %v914_v56, %v909_v48  ;;  %v923_v49 = vmul.f32 %v915_v8, %v907_v20  ;;  %v551_v8 = vld [vmem:[#allocation2 + $0x20] sm:$0xff]  ;;  %v595_v20 = vld [vmem:[#allocation2 + $0x70] sm:$0xff] }
 0x1b0   : > { %v930_v41 = vadd.f32 %v922_v23, %v880_v21  ;;  %v931_v27 = vadd.f32 %v923_v49, %v881_v34  ;;  %v901_v28 = vpop.permute.xlu1 %900  ;;  %v596_v49 = vld [vmem:[#allocation2 + $0x78] sm:$0xff] }
 0x1b1   : > { %v531_v31 = vpop.permute.xlu0 %530  ;;  %v905_v51 = vsel %vm904_vm6, %v897_v42, %v901_v28  ;;  %v911_v33 = vsel %vm904_vm6, %v901_v28, %v889_v32  ;;  %v553_v28 = vld [vmem:[#allocation2 + $0x30] sm:$0xff] }
 0x1b2   : > { %v3432_v54 = vadd.f32 %v3303_v47, %v930_v41  ;;  %v924_v44 = vmul.f32 %v916_v53, %v905_v51  ;;  %v925_v9 = vmul.f32 %v917_v26, %v911_v33  ;;  %v3435_v35 = vadd.f32 %v3303_v47, %v931_v27  ;;  %v693_v27 = vld [vmem:[#allocation2 + $0xe0] sm:$0xff] }
 0x1b4   : > { %v932_v57 = vadd.f32 %v924_v44, %v882_v29  ;;  %v933_v58 = vadd.f32 %v925_v9, %v883_v30  ;;  %1434 = vmatprep.mubr.f32.mxu0 %v3435_v35  ;;  %v3438_v60 = vpop.permute.xlu1 %840  ;;  %v554_v30 = vld [vmem:[#allocation2 + $0x38] sm:$0xff] }
 0x1b5   : > { %v566_v55 = vpop.permute.xlu0 %565  ;;  %1435 = vmatmul.mubr.f32.vlgmr.msra.gmra.mxu0 %v3432_v54 }
 0x1b6   : > { %v3442_v61 = vadd.f32 %v3303_v47, %v932_v57  ;;  %v3445_v32 = vadd.f32 %v3303_v47, %v933_v58 }
 0x1b8   : > { %1509 = vmatprep.mubr.f32.mxu1 %v3445_v32  ;;  %v3448_v38 = vpop.permute.xlu1 %848 }
 0x1b9   : > { %v574_v62 = vpop.permute.xlu0 %573  ;;  %1510 = vmatmul.mubr.f32.vlgmr.msra.gmra.mxu1 %v3442_v61 }
 0x1bc   : > { %v3451_v40 = vpop.permute.xlu1 %890 }
 0x1bd   : > { %v616_v43 = vpop.permute.xlu0 %615 }
 0x1c0   : > { %v3453_v36 = vpop.permute.xlu1 %898 }
 0x1c1   : > { %v624_v63 = vpop.permute.xlu0 %623 }
 0x1c4   : > { %v527_v1 = vpop.permute.xlu1 %526 }
 0x1c5   : > { %v666_v2 = vpop.permute.xlu0 %665  ;;  %v544_v18 = vsel %vm538_vm14, %v523_v19, %v527_v1  ;;  %v542_v25 = vsel %vm538_vm14, %v527_v1, %v531_v31  ;;  %v645_v1 = vld [vmem:[#allocation2 + $0xb0] sm:$0xff] }
 0x1c6   : > { %v560_v29 = vmul.f32 %v552_v17, %v544_v18  ;;  %v695_v18 = vld [vmem:[#allocation2 + $0xf0] sm:$0xff] }
 0x1c8   : > { %v535_v4 = vpop.permute.xlu1 %534 }
 0x1c9   : > { %v674_v42 = vpop.permute.xlu0 %673  ;;  %v546_v12 = vsel %vm538_vm14, %v535_v4, %v523_v19  ;;  %v644_v19 = vld [vmem:[#allocation2 + $0xa8] sm:$0xff]  ;;  %v540_v51 = vsel %vm538_vm14, %v531_v31, %v535_v4 }
 0x1ca   : > { %v559_v53 = vmul.f32 %v551_v8, %v546_v12  ;;  %v562_v8 = vmul.f32 %v554_v30, %v540_v51 }
 0x1cc   : > { %v570_v5 = vpop.permute.xlu1 %569 }
 0x1cd   : > { %v3455_v47 = vpop.permute.xlu0 %740  ;;  %v583_v48 = vsel %vm579_vm15, %v570_v5, %v574_v62  ;;  %v585_v21 = vsel %vm579_vm15, %v566_v55, %v570_v5 }
 0x1ce   : > { %v602_v33 = vmul.f32 %v594_v37, %v585_v21  ;;  %v603_v44 = vmul.f32 %v595_v20, %v583_v48  ;;  %v696_v20 = vld [vmem:[#allocation2 + $0xf8] sm:$0xff] }
 0x1d0   : > { %v578_v3 = vpop.permute.xlu1 %577  ;;  %v610_v17 = vadd.f32 %v602_v33, %v560_v29  ;;  %v868_v29 = vld [vmem:[#allocation2 + $0x1e0] sm:$0xff]  ;;  %v721_v33 = vld [vmem:[#allocation2 + $0x138] sm:$0xff] }
 0x1d1   : > { %v3457_v6 = vpop.permute.xlu0 %748  ;;  %v587_v56 = vsel %vm579_vm15, %v578_v3, %v566_v55  ;;  %v581_v52 = vsel %vm579_vm15, %v574_v62, %v578_v3  ;;  %v694_v55 = vld [vmem:[#allocation2 + $0xe8] sm:$0xff]  ;;  %vm1698_vm15 = vcmask 1041408  }
 0x1d2   : > { %v601_v34 = vmul.f32 %v593_v10, %v587_v56  ;;  %v604_v57 = vmul.f32 %v596_v49, %v581_v52  ;;  %v646_v10 = vld [vmem:[#allocation2 + $0xb8] sm:$0xff]  ;;  %v561_v56 = vmul.f32 %v553_v28, %v542_v25  ;;  %v720_v49 = vld [vmem:[#allocation2 + $0x130] sm:$0xff] }
 0x1d4   : > { %v620_v7 = vpop.permute.xlu1 %619  ;;  %v609_v58 = vadd.f32 %v601_v34, %v559_v53  ;;  %v719_v34 = vld [vmem:[#allocation2 + $0x128] sm:$0xff]  ;;  %v611_v52 = vadd.f32 %v603_v44, %v561_v56  ;;  %v612_v25 = vadd.f32 %v604_v57, %v562_v8  ;;  %v728_v44 = vmul.f32 %v720_v49, %v3071_v59 }
 0x1d5   : > { %v3459_v11 = vpop.permute.xlu0 %790  ;;  %v635_v26 = vsel %vm629_vm1, %v616_v43, %v620_v7  ;;  %v633_v5 = vsel %vm629_vm1, %v620_v7, %v624_v63 }
 0x1d6   : > { %v652_v3 = vmul.f32 %v644_v19, %v635_v26  ;;  %v653_v21 = vmul.f32 %v645_v1, %v633_v5 }
 0x1d8   : > { %v628_v16 = vpop.permute.xlu1 %627  ;;  %v660_v53 = vadd.f32 %v652_v3, %v610_v17  ;;  %v661_v57 = vadd.f32 %v653_v21, %v611_v52 }
 0x1d9   : > { %v3461_v39 = vpop.permute.xlu0 %798  ;;  %v637_v14 = vsel %vm629_vm1, %v628_v16, %v616_v43  ;;  %v631_v31 = vsel %vm629_vm1, %v624_v63, %v628_v16 }
 0x1da   : > { %v651_v41 = vmul.f32 %v643_v13, %v637_v14  ;;  %v718_v14 = vld [vmem:[#allocation2 + $0x120] sm:$0xff]  ;;  %v654_v63 = vmul.f32 %v646_v10, %v631_v31  ;;  %v770_v10 = vld [vmem:[#allocation2 + $0x170] sm:$0xff]  ;;  %v771_v31 = vld [vmem:[#allocation2 + $0x178] sm:$0xff] }
 0x1db   : > { %v726_v19 = vmul.f32 %v718_v14, %v3029_v50  ;;  %v727_v50 = vmul.f32 %v719_v34, %v3249_v22  ;;  %v819_v14 = vld [vmem:[#allocation2 + $0x1a8] sm:$0xff] }
 0x1dc   : > { %v670_v15 = vpop.permute.xlu1 %669  ;;  %v659_v12 = vadd.f32 %v651_v41, %v609_v58  ;;  %v662_v58 = vadd.f32 %v654_v63, %v612_v25 }
 0x1dd   : > { %v3475_v23 = vpop.permute.xlu0 %844  ;;  %v685_v62 = vsel %vm679_vm2, %v666_v2, %v670_v15 }
 0x1de   : > { %v702_v37 = vmul.f32 %v694_v55, %v685_v62  ;;  %v860_v30 = vsel %vm854_vm5, %v3438_v60, %v3475_v23  ;;  %v869_v55 = vld [vmem:[#allocation2 + $0x1e8] sm:$0xff]  ;;  %v858_v62 = vsel %vm854_vm5, %v3475_v23, %v3448_v38  ;;  %v818_v23 = vld [vmem:[#allocation2 + $0x1a0] sm:$0xff] }
 0x1df   : > { %v877_v17 = vmul.f32 %v869_v55, %v858_v62 }
 0x1e0   : > { %v678_v9 = vpop.permute.xlu1 %677  ;;  %v710_v51 = vadd.f32 %v702_v37, %v660_v53 }
 0x1e1   : > { %v687_v43 = vsel %vm679_vm2, %v678_v9, %v666_v2  ;;  %v3493_v13 = vpop.permute.xlu0 %852  ;;  %v683_v2 = vsel %vm679_vm2, %v670_v15, %v674_v42  ;;  %v681_v7 = vsel %vm679_vm2, %v674_v42, %v678_v9  ;;  %v769_v15 = vld [vmem:[#allocation2 + $0x168] sm:$0xff] }
 0x1e2   : > { %v701_v4 = vmul.f32 %v693_v27, %v687_v43  ;;  %v703_v26 = vmul.f32 %v695_v18, %v683_v2  ;;  %v704_v41 = vmul.f32 %v696_v20, %v681_v7  ;;  %v768_v27 = vld [vmem:[#allocation2 + $0x160] sm:$0xff]  ;;  %v735_v2 = vadd.f32 %v727_v50, %v710_v51 }
 0x1e3   : > { %v918_v20 = vld [vmem:[#allocation2 + $0x220] sm:$0xff]  ;;  %v856_v52 = vsel %vm854_vm5, %v3448_v38, %v3493_v13  ;;  %v862_v25 = vsel %vm854_vm5, %v3493_v13, %v3438_v60 }
 0x1e4   : > { %v745_v48 = vpop.permute.xlu1 %744  ;;  %v709_v16 = vadd.f32 %v701_v4, %v659_v12  ;;  %v876_v4 = vmul.f32 %v868_v29, %v860_v30  ;;  %v711_v56 = vadd.f32 %v703_v26, %v661_v57  ;;  %v712_v8 = vadd.f32 %v704_v41, %v662_v58  ;;  %v820_v26 = vld [vmem:[#allocation2 + $0x1b0] sm:$0xff]  ;;  %v821_v41 = vld [vmem:[#allocation2 + $0x1b8] sm:$0xff] }
 0x1e5   : > { %v758_v28 = vsel %vm754_vm3, %v745_v48, %v3457_v6  ;;  %v760_v42 = vsel %vm754_vm3, %v3455_v47, %v745_v48  ;;  %v895_v43 = vpop.permute.xlu0 %894  ;;  %v729_v12 = vmul.f32 %v721_v33, %v3274_v24 }
 0x1e6   : > { %v734_v1 = vadd.f32 %v726_v19, %v709_v16  ;;  %v776_v5 = vmul.f32 %v768_v27, %v760_v42  ;;  %v777_v3 = vmul.f32 %v769_v15, %v758_v28  ;;  %v908_v18 = vsel %vm904_vm6, %v895_v43, %v3453_v36  ;;  %v870_v27 = vld [vmem:[#allocation2 + $0x1f0] sm:$0xff]  ;;  %v871_v15 = vld [vmem:[#allocation2 + $0x1f8] sm:$0xff] }
 0x1e7   : > { %v736_v53 = vadd.f32 %v728_v44, %v711_v56  ;;  %v737_v19 = vadd.f32 %v729_v12, %v712_v8  ;;  %v878_v55 = vmul.f32 %v870_v27, %v856_v52  ;;  %v879_v62 = vmul.f32 %v871_v15, %v862_v25 }
 0x1e8   : > { %v753_v9 = vpop.permute.xlu1 %752  ;;  %v784_v63 = vadd.f32 %v776_v5, %v734_v1  ;;  %v785_v16 = vadd.f32 %v777_v3, %v735_v2  ;;  %v921_v1 = vld [vmem:[#allocation2 + $0x238] sm:$0xff] }
 0x1e9   : > { %v756_v22 = vsel %vm754_vm3, %v3457_v6, %v753_v9  ;;  %v762_v59 = vsel %vm754_vm3, %v753_v9, %v3455_v47  ;;  %v910_v6 = vsel %vm904_vm6, %v3451_v40, %v895_v43  ;;  %v919_v47 = vld [vmem:[#allocation2 + $0x228] sm:$0xff]  ;;  %v903_v29 = vpop.permute.xlu0 %902  ;;  %v920_v43 = vld [vmem:[#allocation2 + $0x230] sm:$0xff] }
 0x1ea   : > { %v778_v7 = vmul.f32 %v770_v10, %v756_v22  ;;  %v779_v48 = vmul.f32 %v771_v31, %v762_v59  ;;  %v926_v28 = vmul.f32 %v918_v20, %v910_v6  ;;  %v927_v42 = vmul.f32 %v919_v47, %v908_v18 }
 0x1eb   : > { %v906_v5 = vsel %vm904_vm6, %v3453_v36, %v903_v29 }
 0x1ec   : > { %v795_v37 = vpop.permute.xlu1 %794  ;;  %v786_v33 = vadd.f32 %v778_v7, %v736_v53  ;;  %v787_v9 = vadd.f32 %v779_v48, %v737_v19  ;;  %v928_v22 = vmul.f32 %v920_v43, %v906_v5  ;;  %v1522_v19 = vld [vmem:[%s3670_s5] sm:$0xf] }
 0x1ed   : > { %v808_v24 = vsel %vm804_vm4, %v795_v37, %v3461_v39  ;;  %v810_v21 = vsel %vm804_vm4, %v3459_v11, %v795_v37 }
 0x1ee   : > { %v826_v34 = vmul.f32 %v818_v23, %v810_v21  ;;  %v827_v49 = vmul.f32 %v819_v14, %v808_v24 }
 0x1f0   : > { %v834_v30 = vadd.f32 %v826_v34, %v784_v63  ;;  %v835_v51 = vadd.f32 %v827_v49, %v785_v16  ;;  %v803_v50 = vpop.permute.xlu1 %802 }
 0x1f1   : > { %v806_v38 = vsel %vm804_vm4, %v3461_v39, %v803_v50  ;;  %v812_v60 = vsel %vm804_vm4, %v803_v50, %v3459_v11  ;;  %v912_v39 = vsel %vm904_vm6, %v903_v29, %v3451_v40  ;;  %v2539_v40 = vmov 0.0  }
 0x1f2   : > { %v884_v13 = vadd.f32 %v876_v4, %v834_v30  ;;  %v885_v44 = vadd.f32 %v877_v17, %v835_v51  ;;  %v828_v57 = vmul.f32 %v820_v26, %v806_v38  ;;  %v829_v58 = vmul.f32 %v821_v41, %v812_v60  ;;  %2351 = vmatprep.subr.mxu0 %v2539_v40  ;;  %v1598_v26 = vld [vmem:[%s3671_s6] sm:$0xff] }
 0x1f3   : > { %v929_v59 = vmul.f32 %v921_v1, %v912_v39  ;;  %v958_v29 = vadd.s32 128, %v2712_v45  ;;  %v960_v51 = vadd.s32 384, %v2712_v45  ;;  %v959_v50 = vadd.s32 256, %v2712_v45 }
 0x1f4   : > { %v836_v3 = vadd.f32 %v828_v57, %v786_v33  ;;  %v837_v10 = vadd.f32 %v829_v58, %v787_v9  ;;  %v934_v31 = vadd.f32 %v926_v28, %v884_v13  ;;  %v935_v11 = vadd.f32 %v927_v42, %v885_v44  ;;  %v1599_v28 = vld [vmem:[%s3671_s6 + $0x8] sm:$0xff] }
 0x1f5   : > { %v963_v42 = vmul.u32 256, %v2716_v46 }
 0x1f6   : > { %v886_v4 = vadd.f32 %v878_v55, %v836_v3  ;;  %v887_v56 = vadd.f32 %v879_v62, %v837_v10 }
 0x1f7   : > { %v968_v30 = vadd.s32 256, %v963_v42  ;;  %vm965_vm10 = vcmp.ge.s32.totalorder %v958_v29, %v963_v42  ;;  %vm967_vm12 = vcmp.ge.s32.totalorder %v960_v51, %v963_v42  ;;  %vm966_vm2 = vcmp.ge.s32.totalorder %v959_v50, %v963_v42 }
 0x1f8   : > { %v936_v8 = vadd.f32 %v928_v22, %v886_v4  ;;  %v937_v12 = vadd.f32 %v929_v59, %v887_v56 }
 0x1f9   : > { %vm970_vm11 = vcmp.lt.s32.totalorder %v958_v29, %v968_v30  ;;  %vm972_vm13 = vcmp.lt.s32.totalorder %v960_v51, %v968_v30  ;;  %vm969_vm1 = vcmp.lt.s32.totalorder %v2712_v45, %v968_v30  ;;  %vm971_vm4 = vcmp.lt.s32.totalorder %v959_v50, %v968_v30 }
 0x1fa   : > { %vm974_vm14 = vmand %vm965_vm10, %vm970_vm11 }
 0x1fb   : > { %v2118_v46 = vsel %vm974_vm14, 1.0, %v2539_v40  ;;  %vm976_vm3 = vmand %vm967_vm12, %vm972_vm13 }
 0x1fc   : > { %v2120_v33 = vsel %vm976_vm3, 1.0, %v2539_v40  ;;  %vm975_vm6 = vmand %vm966_vm2, %vm971_vm4 }
 0x1fd   : > { %v948_v23 = vpop.permute.xlu1 %947  ;;  %v2119_v38 = vsel %vm975_vm6, 1.0, %v2539_v40 }
 0x1fe   : > { %v3555_v14 = vadd.f32 %v948_v23, %v934_v31  ;;  %v3557_v17 = vadd.f32 %v948_v23, %v935_v11  ;;  %v3559_v36 = vadd.f32 %v948_v23, %v936_v8  ;;  %v3561_v18 = vadd.f32 %v948_v23, %v937_v12 }
 0x200   : > { %1439 = vmatprep.mubr.f32.mxu0 %v3557_v17  ;;  %1514 = vmatprep.mubr.f32.mxu1 %v3561_v18 }
 0x201   : > { %1440 = vmatmul.mubr.f32.gmra.mxu0 %v3555_v14  ;;  %1515 = vmatmul.mubr.f32.gmra.mxu1 %v3559_v36 }
 0x202   : > { %2355 = vmatprep.mubr.msk.f32.mxu0 %vm2540_vm7, %v2539_v40  ;;  %2360 = vmatprep.mubr.msk.f32.mxu1 %vm1600_vm9, %v1598_v26  ;;  %vm1691_vm7 = vcmask 15360  }
 0x275   : > { %v2301_v6 = vpop.f32.mrf.mxu0 }
 0x277   : > { %v2302_v37 = vpop.f32.mrf.mxu0 }
 0x278   : > { %v2303_v63 = vadd.f32 %v2302_v37, %v2301_v6 }
 0x279   : > { %v2339_v2 = vpop.f32.mrf.mxu1 }
 0x27b   : > { %v2340_v20 = vpop.f32.mrf.mxu1 }
 0x27c   : > { %v2341_v48 = vadd.f32 %v2340_v20, %v2339_v2 }
 0x27e   : > { %v1512_v49 = vadd.f32 %v2341_v48, %v2303_v63 }
 0x280   : > { %v1520_v53 = vmul.f32 0.00390625, %v1512_v49 }
 0x2c1   : > { %v2304_v47 = vpop.f32.mrf.mxu0  ;;  %v2342_v7 = vpop.f32.mrf.mxu1 }
 0x2c3   : > { %v2305_v24 = vpop.f32.mrf.mxu0  ;;  %v2343_v21 = vpop.f32.mrf.mxu1 }
 0x2c4   : > { %v2306_v16 = vadd.f32 %v2305_v24, %v2304_v47  ;;  %v2344_v34 = vadd.f32 %v2343_v21, %v2342_v7 }
 0x2c6   : > { %v1517_v52 = vadd.f32 %v2344_v34, %v2306_v16 }
 0x2c8   : > { %v1521_v25 = vmul.f32 0.00390625, %v1517_v52 }
 0x2ca   : > { %2352 = vmatpush3.msra.mxu0 %v1521_v25 }
 0x2cb   : > { %2353 = vmatprep.subr.mxu0 %v2539_v40 }
 0x2cc   : > { %2354 = vmatpush3.msra.mxu0 %v1520_v53 }
 0x2cd   : > { %2356 = vmatmul.mubr.msk.f32.vlgmr.msra.gmra.mxu0 %vm1523_vm8, %v1522_v19  ;;  %2253 = vmatprep.subr.msk.mxu0 %vm1698_vm15, %v2118_v46 }
 0x2ce   : > { %1775 = vmatprep.mubr.f32.mxu0 %v2539_v40 }
 0x38d   : > { %v1593_v41 = vpop.f32.mrf.mxu0 }
 0x38e   : > { %v1597_v27 = vmax.f32 %v1593_v41, 0.0 }
 0x38f   : > { %v2357_v15 = vpop.f32.mrf.mxu0 }
 0x390   : > { %2358 = vmatprep.subr.msk.mxu1 %vm381_vm0, %v1597_v27 }
 0x391   : > { %2359 = vmatpush3.msk.msra.mxu1 %vm381_vm0, %v1597_v27  ;;  %vm964_vm0 = vcmp.ge.s32.totalorder %v2712_v45, %v963_v42 }
 0x392   : > { %2361 = vmatmul.mubr.msk.f32.vlgmr.msra.gmra.mxu1 %vm1600_vm9, %v1599_v28  ;;  %vm973_vm5 = vmand %vm964_vm0, %vm969_vm1  ;;  %2257 = vmatprep.subr.msk.mxu1 %vm1698_vm15, %v2120_v33 }
 0x393   : > { %1852 = vmatprep.mubr.f32.mxu1 %v2539_v40  ;;  %v2117_v9 = vsel %vm973_vm5, 1.0, %v2539_v40  ;;  %2258 = vmatpush1.msk.msra.mxu1 %vm1698_vm15, %v2119_v38 }
 0x394   : > { %2254 = vmatpush1.msk.msra.mxu0 %vm1698_vm15, %v2117_v9 }
 0x452   : > { %v2362_v60 = vpop.f32.mrf.mxu1 }
 0x453   : > { %v1682_v13 = vadd.f32 3.0, %v2362_v60 }
 0x454   : > { %v1676_v45 = vpop.f32.mrf.mxu1 }
 0x455   : > { %v1677_v44 = vadd.f32 3.0, %v1676_v45  ;;  %v1686_v57 = vmax.f32 %v1682_v13, 0.0 }
 0x457   : > { %v1685_v58 = vmax.f32 %v1677_v44, 0.0  ;;  %v1688_v62 = vmin.f32 %v1686_v57, 6.0 }
 0x459   : > { %v1687_v55 = vmin.f32 %v1685_v58, 6.0  ;;  %v1690_v1 = vmul.f32 0.16666667, %v1688_v62  ;;  %v1922_v62 = vpop.permute.xlu0 %1921 }
 0x45b   : > { %v1689_v43 = vmul.f32 0.16666667, %v1687_v55  ;;  %v1913_v55 = vld [vmem:[%s3672_s7] sm:$0xf] }
 0x45d   : > { %2255 = vmatmul.mubr.msk.f32.vlgmr.msra.gmra.mxu0 %vm1691_vm7, %v1689_v43  ;;  %2259 = vmatmul.mubr.msk.f32.vlgmr.msra.gmra.mxu1 %vm1691_vm7, %v1689_v43 }
 0x45e   : > { %1781 = vmatprep.mubr.f32.mxu0 %v2539_v40  ;;  %1858 = vmatprep.mubr.f32.mxu1 %v2539_v40 }
 0x461   : > { %2256 = vmatmul.mubr.msk.f32.gmra.mxu0 %vm1691_vm7, %v1690_v1  ;;  %2260 = vmatmul.mubr.msk.f32.gmra.mxu1 %vm1691_vm7, %v1690_v1 }
 0x462   : > { %1959 = vmatprep.mubr.bf16.mxu0 %v2529_v0  ;;  %2000 = vmatprep.mubr.bf16.mxu1 %v2529_v0 }
 0x51d   : > { %v1777_v5 = vpop.f32.mrf.mxu0  ;;  %v1854_v39 = vpop.f32.mrf.mxu1 }
 0x51e   : > { %v1865_v3 = vmul.f32 %v1777_v5, %v3432_v54  ;;  %v1867_v10 = vmul.f32 %v1854_v39, %v3442_v61 }
 0x51f   : > { %v1779_v31 = vpop.f32.mrf.mxu0  ;;  %v1856_v11 = vpop.f32.mrf.mxu1 }
 0x520   : > { %v1873_v22 = vadd.f32 3.0, %v1865_v3  ;;  %v1875_v59 = vadd.f32 3.0, %v1867_v10  ;;  %v1866_v4 = vmul.f32 %v1779_v31, %v3435_v35  ;;  %v1868_v56 = vmul.f32 %v1856_v11, %v3445_v32  ;;  %v2430_v31 = vld [vmem:[%s2666_s21] sm:$0xff] }
 0x521   : > { %v1783_v8 = vpop.f32.mrf.mxu0  ;;  %v1860_v12 = vpop.f32.mrf.mxu1 }
 0x522   : > { %v1874_v23 = vadd.f32 3.0, %v1866_v4  ;;  %v1876_v40 = vadd.f32 3.0, %v1868_v56  ;;  %v1869_v0 = vmul.f32 %v1783_v8, %v3555_v14  ;;  %v1871_v6 = vmul.f32 %v1860_v12, %v3559_v36 }
 0x523   : > { %v1785_v2 = vpop.f32.mrf.mxu0  ;;  %v1862_v54 = vpop.f32.mrf.mxu1  ;;  %v1881_v37 = vmax.f32 %v1873_v22, 0.0  ;;  %v1883_v61 = vmax.f32 %v1875_v59, 0.0  ;;  %v2431_v22 = vld [vmem:[%s2666_s21 + $0x10] sm:$0xff] }
 0x524   : > { %v1882_v20 = vmax.f32 %v1874_v23, 0.0  ;;  %v1884_v47 = vmax.f32 %v1876_v40, 0.0  ;;  %v1877_v7 = vadd.f32 3.0, %v1869_v0  ;;  %v1879_v48 = vadd.f32 3.0, %v1871_v6  ;;  %v2432_v23 = vld [vmem:[%s2666_s21 + $0x8] sm:$0xff] }
 0x525   : > { %v1870_v35 = vmul.f32 %v1785_v2, %v3557_v17  ;;  %v1872_v32 = vmul.f32 %v1862_v54, %v3561_v18  ;;  %v1889_v49 = vmin.f32 %v1881_v37, 6.0  ;;  %v1891_v36 = vmin.f32 %v1883_v61, 6.0 }
 0x526   : > { %v1890_v24 = vmin.f32 %v1882_v20, 6.0  ;;  %v1892_v21 = vmin.f32 %v1884_v47, 6.0  ;;  %v1885_v63 = vmax.f32 %v1877_v7, 0.0  ;;  %v1887_v16 = vmax.f32 %v1879_v48, 0.0 }
 0x527   : > { %v1878_v34 = vadd.f32 3.0, %v1870_v35  ;;  %v1880_v14 = vadd.f32 3.0, %v1872_v32  ;;  %v1897_v42 = vmul.f32 0.16666667, %v1889_v49  ;;  %v1899_v18 = vmul.f32 0.16666667, %v1891_v36 }
 0x528   : > { %v1893_v52 = vmin.f32 %v1885_v63, 6.0  ;;  %v1895_v25 = vmin.f32 %v1887_v16, 6.0  ;;  %v1898_v26 = vmul.f32 0.16666667, %v1890_v24  ;;  %v1900_v41 = vmul.f32 0.16666667, %v1892_v21 }
 0x529   : > { %v1886_v53 = vmax.f32 %v1878_v34, 0.0  ;;  %v1888_v19 = vmax.f32 %v1880_v14, 0.0  ;;  %v1905_v60 = vmul.f32 %v1897_v42, %v1865_v3  ;;  %v1907_v13 = vmul.f32 %v1899_v18, %v1867_v10 }
 0x52a   : > { %v1901_v27 = vmul.f32 0.16666667, %v1893_v52  ;;  %v1903_v15 = vmul.f32 0.16666667, %v1895_v25  ;;  %v1906_v46 = vmul.f32 %v1898_v26, %v1866_v4  ;;  %v1908_v33 = vmul.f32 %v1900_v41, %v1868_v56 }
 0x52b   : > { %v1894_v28 = vmin.f32 %v1886_v53, 6.0  ;;  %v1896_v17 = vmin.f32 %v1888_v19, 6.0 }
 0x52c   : > { %v1909_v51 = vmul.f32 %v1901_v27, %v1869_v0  ;;  %v1911_v50 = vmul.f32 %v1903_v15, %v1871_v6  ;;  %v2433_v0 = vld [vmem:[%s2666_s21 + $0x18] sm:$0xff]  ;;  %s2541_s21 = smov [#allocation5]  }
 0x52d   : > { %v1902_v29 = vmul.f32 0.16666667, %v1894_v28  ;;  %v1904_v30 = vmul.f32 0.16666667, %v1896_v17  ;;  %s2464_s26 = sshll.u32 %s2541_s21, 4  ;;  %s2465_s26 = int_to_ptr.vmem [resolvable:$false] %s2464_s26 }
 0x52e   : > { %v1914_v57 = vpack.c.bf16 %v1909_v51, %v1905_v60  ;;  %v1916_v58 = vpack.c.bf16 %v1911_v50, %v1907_v13  ;;  %s2466_s27 = scalar_lea.vmem %s2465_s26, 1024  ;;  %p2467_p11 = scmp.lt.s32.totalorder %s3624_s17, %s2465_s26 }
 0x52f   : > { %v1910_v9 = vmul.f32 %v1902_v29, %v1870_v35  ;;  %v1912_v38 = vmul.f32 %v1904_v30, %v1872_v32  ;;  %p2468_p12 = scmp.lt.s32.totalorder %s2466_s27, %s2460_s25 }
 0x531   : > { %v1915_v45 = vpack.c.bf16 %v1910_v9, %v1906_v46  ;;  %v1917_v44 = vpack.c.bf16 %v1912_v38, %v1908_v33  ;;  %p2469_p13 = por %p2468_p12, %p2467_p11 }
 0x533   : > { %1941 = vmatprep.subr.bf16.mxu0 %v1915_v45  ;;  %1982 = vmatprep.subr.bf16.mxu1 %v1917_v44  ;;  %p2470_p0 = pnand %p2469_p13, %p2463_p10 }
 0x534   : > { %1942 = vmatpush1.bf16.msra.mxu0 %v1914_v57  ;;  %1983 = vmatpush1.bf16.msra.mxu1 %v1916_v58 }
 0x537   : > { %2261 = vmatmul.mubr.msk.bf16.vlgmr.msra.gmra.mxu0 %vm1523_vm8, %v1913_v55  ;;  %2262 = vmatmul.mubr.msk.bf16.vlgmr.msra.gmra.mxu1 %vm1523_vm8, %v1913_v55 }
 0x5f7   : > { %v1961_v43 = vpop.f32.mrf.mxu0  ;;  %v2002_v1 = vpop.f32.mrf.mxu1 }
 0x5f8   : > { %v1962_v5 = vadd.f32 %v1961_v43, %v1922_v62  ;;  %v2003_v39 = vadd.f32 %v2002_v1, %v1922_v62 }
 0x5f9   : > { %v1963_v3 = vpop.f32.mrf.mxu0  ;;  %v2004_v10 = vpop.f32.mrf.mxu1 }
 0x5fa   : > { %v2009_v11 = vadd.f32 %v2430_v31, %v1962_v5  ;;  %v2011_v59 = vadd.f32 %v2431_v22, %v2003_v39  ;;  %v1964_v4 = vadd.f32 %v1963_v3, %v1922_v62  ;;  %v2005_v56 = vadd.f32 %v2004_v10, %v1922_v62 }
 0x5fb   : > { %v1965_v8 = vpop.f32.mrf.mxu0  ;;  %v2006_v12 = vpop.f32.mrf.mxu1 }
 0x5fc   : > { %2013 = vst [vmem:[%s341_s16] sm:$0xff] %v2009_v11  ;;  %2015 = vst [vmem:[%s341_s16 + $0x10] sm:$0xff] %v2011_v59  ;;  %v2010_v40 = vadd.f32 %v2432_v23, %v1964_v4  ;;  %v2012_v6 = vadd.f32 %v2433_v0, %v2005_v56 }
 0x5fd   : > { %v1966_v2 = vpop.f32.mrf.mxu0  ;;  %v2007_v54 = vpop.f32.mrf.mxu1 }
 0x5fe   : > { %2014 = vst [vmem:[%s341_s16 + $0x8] sm:$0xff] %v2010_v40  ;;  %2016 = vst [vmem:[%s341_s16 + $0x18] sm:$0xff] %v2012_v6 }
 0x5ff   : > { %2473 = shalt.err (!%p2470_p0)
}
 0x600   : > { %s2474_s29 = scalar_lea.hbm %s3622_s23, 512  ;;  %s2478_s16 = scalar_lea.hbm %s3674_s9, 1024 }
 0x601   : > { %p2475_p1 = scmp.ne.s32.totalorder %s3622_s23, %s2474_s29  ;;  %p2479_p4 = scmp.lt.s32.totalorder %s3622_s23, %s3674_s9 }
 0x602   : > { %p2480_p7 = scmp.lt.s32.totalorder %s2478_s16, %s2474_s29 }
 0x603   : > { %p2476_p2 = pnand %p2475_p1, %p2630_p5 }
 0x604   : > { %p2481_p8 = por %p2480_p7, %p2479_p4 }
 0x605   : > { %p2477_p3 = pneg %p2476_p2 }
 0x607   : > { %p2482_p6 = pnand %p2481_p8, %p2477_p3 }
 0x609   : > { %2485 = shalt.err (!%p2482_p6)
}
 0x60a   : > { %2367 = dma.vmem_to_hbm [thread:$0]  (%p2630_p5), %s3624_s17, 512, %s3622_s23, %s2018_s24  }
 0x60b PF: > { %p2379_p9 = scmp.ge.s32.totalorder %s2524_s12, 2  ;;  %s2044_s25 = sand.u32 1, %s2512_s30  }
 0x60c   : > { %p3678_p10 = scmp.ne.s32.totalorder %s3676_s20, 0  ;;  %s2045_s21 = scalar_lea.sflag [#allocation4], %s2044_s25 }
 0x60e   : > { %p2374_p11 = pnand %p2379_p9, %p3678_p10 }
 0x610   : > { %p2375_p12 = pneg %p2374_p11 }
 0x612   : > { %2507 = dma.done.wait (%p2375_p12), %s2045_s21, 512  }
 0x613   : > { %2509 = vsyncadd (%p2375_p12), %s2045_s21, 4294966784  ;;  %p20_p13 = scmp.ge.s32.totalorder %s2617_s15, 4   ;;  %s3679_s30 = smov %s2516_s10 }
 0x614   : > { %s3680_s10 = smov %s2520_s11  ;;  %s3681_s11 = smov %s2628_s18 }
 0x615   : > { %s3682_s12 = smov %s2617_s15  ;;  %22 = sbr.rel (!%p20_p13) target bundleno = 4 (0x4), region = 104 }
 0x61a   :  { %2050 = vsyncpa [#allocation3], 1 }
 0x61b   :  { %2052 = vsyncpa [#allocation3 + $0x1], 1 }
 0x61c   :  { %2053 = vsyncpa [#allocation4], 1 }
 0x61d   :  { %2055 = vsyncpa [#allocation4 + $0x1], 1 }

</bundles_post_ra>
